<compile_context>
chip_gen: v7x
topology: tpu7x:2x2x1
jax: 0.10.0
libtpu: 0.0.40
codegen_flags: <defaults>
</compile_context>

<pallas_src>
import functools
import math

import jax
import jax.numpy as jnp
from jax.experimental import pallas as pl
from jax.experimental.pallas import tpu as pltpu


# ---------------------------------------------------------------------------
# Shared math (used by the Pallas kernel body AND the precision-matched
# reference, so the correctness check is tight).
# ---------------------------------------------------------------------------
def _layer_norm(x, gamma, beta, eps=1e-5):
    # x: (M, E) f32, gamma/beta: (1, E) -- matches torch.nn.LayerNorm (biased var)
    mean = jnp.mean(x, axis=-1, keepdims=True)
    xc = x - mean
    var = jnp.mean(xc * xc, axis=-1, keepdims=True)
    inv = jax.lax.rsqrt(var + eps)
    return xc * inv * gamma + beta


def _encoder_layer_math(x,
                        ln0_g, ln0_b,
                        wqkv, bqkv,
                        wo, bo,
                        ln1_g, ln1_b,
                        w1, b1,
                        w2, b2,
                        *, num_heads, head_dim):
    """x: (bt, S, E) float32, batch-major.  Weights bf16, biases/LN params f32.

    Matmul operands are cast to bf16 at the boundary (native MXU rate, half the
    weight bytes); accumulation stays f32 via preferred_element_type.  All
    elementwise / transcendental math stays f32.
    """
    bt, S, E = x.shape
    M = bt * S
    bf16 = jnp.bfloat16

    xr = x.reshape(M, E)
    residual = xr

    # ---- self-attention block (pre-LN) ------------------------------------
    h = _layer_norm(xr, ln0_g, ln0_b)

    # Fused QKV projection: (M,E)@(E,3E), K=E.  1/sqrt(Dh) is folded into the
    # q third of wqkv/bqkv host-side.
    qkv = jnp.dot(h.astype(bf16), wqkv, preferred_element_type=jnp.float32) + bqkv

    head_outs = []
    for hd in range(num_heads):                  # static unroll, H small
        lo = hd * head_dim
        hi = lo + head_dim
        # NOTE: at production scale head_dim % 128 == 0 makes these slices
        # aligned (free) views; at toy E=32 they are sub-lane slices.
        qh = qkv[:, lo:hi].reshape(bt, S, head_dim).astype(bf16)
        kh = qkv[:, E + lo:E + hi].reshape(bt, S, head_dim).astype(bf16)
        vh = qkv[:, 2 * E + lo:2 * E + hi].reshape(bt, S, head_dim).astype(bf16)

        # Leading-batch-dim batched matmuls (lowering-safe form).
        s = jnp.einsum('bqd,bkd->bqk', qh, kh,
                       preferred_element_type=jnp.float32)        # (bt,S,S) f32
        m = jnp.max(s, axis=-1, keepdims=True)
        e = jnp.exp(s - m)
        p = e / jnp.sum(e, axis=-1, keepdims=True)                # exact softmax
        oh = jnp.einsum('bqk,bkd->bqd', p.astype(bf16), vh,
                        preferred_element_type=jnp.float32)       # (bt,S,Dh)
        head_outs.append(oh)

    # Assemble heads once (single lane concat), then ONE full-depth (K=E)
    # output projection instead of H separate K=head_dim matmuls.
    attn = jnp.concatenate(head_outs, axis=-1).reshape(M, E)
    attn = jnp.dot(attn.astype(bf16), wo, preferred_element_type=jnp.float32) + bo

    xr = residual + attn                          # res_dropout identity (eval)

    # ---- feed-forward block (pre-LN) ---------------------------------------
    residual = xr
    h2 = _layer_norm(xr, ln1_g, ln1_b)
    f = jnp.dot(h2.astype(bf16), w1, preferred_element_type=jnp.float32) + b1
    f = jnp.maximum(f, 0.0)                       # relu (relu_dropout identity)
    f = jnp.dot(f.astype(bf16), w2, preferred_element_type=jnp.float32) + b2
    out = residual + f

    return out.reshape(bt, S, E)


# ---------------------------------------------------------------------------
# Kernel
# ---------------------------------------------------------------------------
def encoder_layer_kernel(x_ref,
                         ln0_g_ref, ln0_b_ref,
                         wqkv_ref, bqkv_ref,
                         wo_ref, bo_ref,
                         ln1_g_ref, ln1_b_ref,
                         w1_ref, b1_ref,
                         w2_ref, b2_ref,
                         o_ref,
                         *, num_heads, head_dim):
    x = x_ref[...].astype(jnp.float32)            # (bt, S, E)
    out = _encoder_layer_math(
        x,
        ln0_g_ref[...], ln0_b_ref[...],
        wqkv_ref[...], bqkv_ref[...],
        wo_ref[...], bo_ref[...],
        ln1_g_ref[...], ln1_b_ref[...],
        w1_ref[...], b1_ref[...],
        w2_ref[...], b2_ref[...],
        num_heads=num_heads, head_dim=head_dim)
    o_ref[...] = out.astype(o_ref.dtype)


# ---------------------------------------------------------------------------
# Wrappers
# ---------------------------------------------------------------------------
def _choose_bt(B, S, rows_target=256, min_programs=2):
    """Pick batch-elements-per-program.

    Priority 1: give at least `min_programs` grid steps (v7x has 2 TensorCores,
    and the "parallel" axis only helps if there are >= 2 programs).
    Priority 2: grow toward ~rows_target rows per program so the matmul M
    dimension keeps the 256-deep v6e/v7x MXU fed.
    """
    bt = max(1, min(B, rows_target // max(S, 1)))
    while B % bt:
        bt -= 1
    while bt > 1 and (B // bt) < min(min_programs, B):
        bt -= 1
        while B % bt:
            bt -= 1
    return bt


def transformer_encoder_layer_bse(x_bse, params, *, num_heads, rows_per_program=256):
    """Batch-major entry point: x (batch, seq_len, embed_dim) -> same shape.

    Preferred path: no activation transposes at all.
    """
    B, S, E = x_bse.shape
    head_dim = E // num_heads
    bt = _choose_bt(B, S, rows_target=rows_per_program)
    grid = (B // bt,)

    # Weight / bias / LN-param specs: block index is constant across the grid,
    # so single-buffer them (halves their VMEM footprint vs default).
    def const_spec(shape):
        zero = (0,) * len(shape)
        return pl.BlockSpec(shape, lambda b, _z=zero: _z,
                            pipeline_mode=pl.Buffered(1))

    in_specs = [
        pl.BlockSpec((bt, S, E), lambda b: (b, 0, 0)),   # x (last two dims full)
        const_spec((1, E)), const_spec((1, E)),          # ln0 gamma/beta
        const_spec((E, 3 * E)), const_spec((1, 3 * E)),  # fused Wqkv^T (bf16), bqkv
        const_spec((E, E)), const_spec((1, E)),          # Wo^T (bf16), bo
        const_spec((1, E)), const_spec((1, E)),          # ln1 gamma/beta
        const_spec((E, 4 * E)), const_spec((1, 4 * E)),  # W1^T (bf16), b1
        const_spec((4 * E, E)), const_spec((1, E)),      # W2^T (bf16), b2
    ]

    kernel = functools.partial(encoder_layer_kernel,
                               num_heads=num_heads, head_dim=head_dim)

    return pl.pallas_call(
        kernel,
        out_shape=jax.ShapeDtypeStruct((B, S, E), x_bse.dtype),
        grid=grid,
        in_specs=in_specs,
        out_specs=pl.BlockSpec((bt, S, E), lambda b: (b, 0, 0)),
        compiler_params=pltpu.CompilerParams(
            dimension_semantics=("parallel",),
            # Explicit budget: v7x only has 64 MiB of VMEM (32 MiB default scoped).
            vmem_limit_bytes=64 * 1024 * 1024,
        ),
    )(x_bse, *params)


def transformer_encoder_layer(x_sbe, params, *, num_heads, rows_per_program=256):
    """Module-contract entry point: x (seq_len, batch, embed_dim) -> same shape.

    TODO(synk): in a full model keep activations batch-major across layers so
    this transpose pair (a full HBM read+write each) disappears entirely.
    """
    x_bse = jnp.transpose(x_sbe, (1, 0, 2))
    out_bse = transformer_encoder_layer_bse(x_bse, params, num_heads=num_heads,
                                            rows_per_program=rows_per_program)
    return jnp.transpose(out_bse, (1, 0, 2))


# ---------------------------------------------------------------------------
# Deterministic parameter construction (shapes per the PyTorch __init__)
# ---------------------------------------------------------------------------
def _xavier_uniform(key, shape):
    fan_out, fan_in = shape
    limit = math.sqrt(6.0 / (fan_in + fan_out))
    return jax.random.uniform(key, shape, jnp.float32, -limit, limit)


def make_params(key, embed_dim, num_heads):
    E = embed_dim
    Dh = E // num_heads
    scale = 1.0 / math.sqrt(Dh)
    keys = jax.random.split(key, 12)
    # MultiheadAttention in-projection (3E, E) split into q/k/v, out_proj (E, E)
    wq = _xavier_uniform(keys[0], (E, E))
    wk = _xavier_uniform(keys[1], (E, E))
    wv = _xavier_uniform(keys[2], (E, E))
    bq = jax.random.normal(keys[3], (1, E), jnp.float32) * 0.02
    bk = jax.random.normal(keys[4], (1, E), jnp.float32) * 0.02
    bv = jax.random.normal(keys[5], (1, E), jnp.float32) * 0.02
    wo = _xavier_uniform(keys[6], (E, E))
    bo = jax.random.normal(keys[7], (1, E), jnp.float32) * 0.02
    # fc1: (4E, E), fc2: (E, 4E)   (PyTorch Linear weight is (out, in))
    w1 = _xavier_uniform(keys[8], (4 * E, E))
    b1 = jnp.zeros((1, 4 * E), jnp.float32)
    w2 = _xavier_uniform(keys[9], (E, 4 * E))
    b2 = jnp.zeros((1, E), jnp.float32)
    # LayerNorms: non-trivial deterministic gamma/beta to exercise the math
    ln0_g = 1.0 + 0.1 * jax.random.normal(keys[10], (1, E), jnp.float32)
    ln0_b = 0.1 * jax.random.normal(keys[11], (1, E), jnp.float32)
    ln1_g = jnp.ones((1, E), jnp.float32)
    ln1_b = jnp.zeros((1, E), jnp.float32)

    # Kernel weight layout: fused, transposed QKV with the 1/sqrt(Dh) scale
    # folded into the q third (done in f32, then cast).  All matmul weights are
    # stored bf16 (halves weight DMA bytes and VMEM residency; native MXU rate).
    wqkv_t = jnp.concatenate([wq.T * scale, wk.T, wv.T], axis=1)   # (E, 3E)
    bqkv = jnp.concatenate([bq * scale, bk, bv], axis=1)           # (1, 3E) f32

    params = (
        ln0_g, ln0_b,
        wqkv_t.astype(jnp.bfloat16), bqkv,
        wo.T.astype(jnp.bfloat16), bo,
        ln1_g, ln1_b,
        w1.T.astype(jnp.bfloat16), b1,
        w2.T.astype(jnp.bfloat16), b2,
    )
    raw = dict(wq=wq, wk=wk, wv=wv, bq=bq, bk=bk, bv=bv, wo=wo, bo=bo,
               w1=w1, b1=b1, w2=w2, b2=b2,
               ln0_g=ln0_g, ln0_b=ln0_b, ln1_g=ln1_g, ln1_b=ln1_b)
    return params, raw


# ---------------------------------------------------------------------------
# References
# ---------------------------------------------------------------------------
def matched_reference(x_sbe, params, *, num_heads):
    """Precision-matched pure-JAX reference: same math function as the kernel
    body (bf16 matmul operands, f32 accumulation, exact softmax)."""
    S, B, E = x_sbe.shape
    x_bse = jnp.transpose(x_sbe, (1, 0, 2)).astype(jnp.float32)
    out = _encoder_layer_math(x_bse, *params,
                              num_heads=num_heads, head_dim=E // num_heads)
    return jnp.transpose(out, (1, 0, 2))


def reference_forward(x_sbe, raw, *, num_heads):
    """Faithful f32 mirror of the PyTorch forward (eval mode)."""
    S, B, E = x_sbe.shape
    Dh = E // num_heads
    eps = 1e-5

    def ln(x, g, b):
        mu = x.mean(-1, keepdims=True)
        var = ((x - mu) ** 2).mean(-1, keepdims=True)
        return (x - mu) / jnp.sqrt(var + eps) * g + b

    residual = x_sbe
    h = ln(x_sbe, raw["ln0_g"][0], raw["ln0_b"][0])
    q = h @ raw["wq"].T + raw["bq"][0]
    k = h @ raw["wk"].T + raw["bk"][0]
    v = h @ raw["wv"].T + raw["bv"][0]

    def split(t):  # (S, B, E) -> (B, H, S, Dh)
        return jnp.transpose(t.reshape(S, B, num_heads, Dh), (1, 2, 0, 3))

    qh, kh, vh = split(q), split(k), split(v)
    s = jnp.einsum("bhqd,bhkd->bhqk", qh * (1.0 / math.sqrt(Dh)), kh)
    p = jax.nn.softmax(s, axis=-1)
    o = jnp.einsum("bhqk,bhkd->bhqd", p, vh)              # (B, H, S, Dh)
    o = jnp.transpose(o, (2, 0, 1, 3)).reshape(S, B, E)
    attn = o @ raw["wo"].T + raw["bo"][0]
    x = residual + attn

    residual = x
    h2 = ln(x, raw["ln1_g"][0], raw["ln1_b"][0])
    f = jnp.maximum(h2 @ raw["w1"].T + raw["b1"][0], 0.0)
    f = f @ raw["w2"].T + raw["b2"][0]
    return residual + f


# ---------------------------------------------------------------------------
if __name__ == "__main__":
    SEQ, BATCH, EMBED, HEADS = 8, 2, 32, 4

    key = jax.random.PRNGKey(0)
    kx, kp = jax.random.split(key)
    x = jax.random.normal(kx, (SEQ, BATCH, EMBED), jnp.float32)

    params, raw = make_params(kp, EMBED, HEADS)

    out = transformer_encoder_layer(x, params, num_heads=HEADS)
    out = jax.block_until_ready(out)
    assert out.shape == (SEQ, BATCH, EMBED)

    # Tight check vs the precision-matched reference (same math/precision path).
    ref_m = matched_reference(x, params, num_heads=HEADS)
    diff_m = float(jnp.max(jnp.abs(out - ref_m)))
    assert jnp.allclose(out, ref_m, rtol=2e-3, atol=2e-3), \
        f"matched-reference max abs diff = {diff_m}"

    # Loose sanity check vs the faithful f32 PyTorch-style reference; the gap is
    # the expected bf16-matmul mixed-precision error, not a semantics difference.
    ref_f32 = reference_forward(x, raw, num_heads=HEADS)
    diff_f = float(jnp.max(jnp.abs(out - ref_f32)))
    assert jnp.allclose(out, ref_f32, rtol=1e-1, atol=1e-1), \
        f"f32-reference max abs diff = {diff_f}"

    print("KERNEL_OK")
</pallas_src>

<mosaic_0001>
module attributes {stable_mosaic.version = 11 : i64} {
  func.func @encoder_layer_kernel(%arg0: i32, %arg1: memref<1x8x32xf32, #tpu.memory_space<vmem>>, %arg2: memref<1x32xf32, #tpu.memory_space<vmem>>, %arg3: memref<1x32xf32, #tpu.memory_space<vmem>>, %arg4: memref<32x96xbf16, #tpu.memory_space<vmem>>, %arg5: memref<1x96xf32, #tpu.memory_space<vmem>>, %arg6: memref<32x32xbf16, #tpu.memory_space<vmem>>, %arg7: memref<1x32xf32, #tpu.memory_space<vmem>>, %arg8: memref<1x32xf32, #tpu.memory_space<vmem>>, %arg9: memref<1x32xf32, #tpu.memory_space<vmem>>, %arg10: memref<32x128xbf16, #tpu.memory_space<vmem>>, %arg11: memref<1x128xf32, #tpu.memory_space<vmem>>, %arg12: memref<128x32xbf16, #tpu.memory_space<vmem>>, %arg13: memref<1x32xf32, #tpu.memory_space<vmem>>, %arg14: memref<1x8x32xf32, #tpu.memory_space<vmem>>) attributes {dimension_semantics = [#tpu.dimension_semantics<parallel>], iteration_bounds = array<i64: 2>, scalar_prefetch = 0 : i64, scratch_operands = 0 : i64, tpu.core_type = #tpu.core_type<tc>, window_params = [{transform_indices = @transform_0, window_bounds = array<i64: 1, 8, 32>}, {pipeline_mode = #tpu.pipeline_mode<synchronous>, transform_indices = @transform_1, window_bounds = array<i64: 1, 32>}, {pipeline_mode = #tpu.pipeline_mode<synchronous>, transform_indices = @transform_2, window_bounds = array<i64: 1, 32>}, {pipeline_mode = #tpu.pipeline_mode<synchronous>, transform_indices = @transform_3, window_bounds = array<i64: 32, 96>}, {pipeline_mode = #tpu.pipeline_mode<synchronous>, transform_indices = @transform_4, window_bounds = array<i64: 1, 96>}, {pipeline_mode = #tpu.pipeline_mode<synchronous>, transform_indices = @transform_5, window_bounds = array<i64: 32, 32>}, {pipeline_mode = #tpu.pipeline_mode<synchronous>, transform_indices = @transform_6, window_bounds = array<i64: 1, 32>}, {pipeline_mode = #tpu.pipeline_mode<synchronous>, transform_indices = @transform_7, window_bounds = array<i64: 1, 32>}, {pipeline_mode = #tpu.pipeline_mode<synchronous>, transform_indices = @transform_8, window_bounds = array<i64: 1, 32>}, {pipeline_mode = #tpu.pipeline_mode<synchronous>, transform_indices = @transform_9, window_bounds = array<i64: 32, 128>}, {pipeline_mode = #tpu.pipeline_mode<synchronous>, transform_indices = @transform_10, window_bounds = array<i64: 1, 128>}, {pipeline_mode = #tpu.pipeline_mode<synchronous>, transform_indices = @transform_11, window_bounds = array<i64: 128, 32>}, {pipeline_mode = #tpu.pipeline_mode<synchronous>, transform_indices = @transform_12, window_bounds = array<i64: 1, 32>}, {transform_indices = @transform_13, window_bounds = array<i64: 1, 8, 32>}]} {
    %c0 = arith.constant 0 : index
    %c0_0 = arith.constant 0 : index
    %c0_1 = arith.constant 0 : index
    %0 = vector.load %arg1[%c0, %c0_0, %c0_1] : memref<1x8x32xf32, #tpu.memory_space<vmem>>, vector<1x8x32xf32>
    %c0_2 = arith.constant 0 : index
    %c0_3 = arith.constant 0 : index
    %1 = vector.load %arg2[%c0_2, %c0_3] : memref<1x32xf32, #tpu.memory_space<vmem>>, vector<1x32xf32>
    %c0_4 = arith.constant 0 : index
    %c0_5 = arith.constant 0 : index
    %2 = vector.load %arg3[%c0_4, %c0_5] : memref<1x32xf32, #tpu.memory_space<vmem>>, vector<1x32xf32>
    %c0_6 = arith.constant 0 : index
    %c0_7 = arith.constant 0 : index
    %3 = vector.load %arg4[%c0_6, %c0_7] : memref<32x96xbf16, #tpu.memory_space<vmem>>, vector<32x96xbf16>
    %c0_8 = arith.constant 0 : index
    %c0_9 = arith.constant 0 : index
    %4 = vector.load %arg5[%c0_8, %c0_9] : memref<1x96xf32, #tpu.memory_space<vmem>>, vector<1x96xf32>
    %c0_10 = arith.constant 0 : index
    %c0_11 = arith.constant 0 : index
    %5 = vector.load %arg6[%c0_10, %c0_11] : memref<32x32xbf16, #tpu.memory_space<vmem>>, vector<32x32xbf16>
    %c0_12 = arith.constant 0 : index
    %c0_13 = arith.constant 0 : index
    %6 = vector.load %arg7[%c0_12, %c0_13] : memref<1x32xf32, #tpu.memory_space<vmem>>, vector<1x32xf32>
    %c0_14 = arith.constant 0 : index
    %c0_15 = arith.constant 0 : index
    %7 = vector.load %arg8[%c0_14, %c0_15] : memref<1x32xf32, #tpu.memory_space<vmem>>, vector<1x32xf32>
    %c0_16 = arith.constant 0 : index
    %c0_17 = arith.constant 0 : index
    %8 = vector.load %arg9[%c0_16, %c0_17] : memref<1x32xf32, #tpu.memory_space<vmem>>, vector<1x32xf32>
    %c0_18 = arith.constant 0 : index
    %c0_19 = arith.constant 0 : index
    %9 = vector.load %arg10[%c0_18, %c0_19] : memref<32x128xbf16, #tpu.memory_space<vmem>>, vector<32x128xbf16>
    %c0_20 = arith.constant 0 : index
    %c0_21 = arith.constant 0 : index
    %10 = vector.load %arg11[%c0_20, %c0_21] : memref<1x128xf32, #tpu.memory_space<vmem>>, vector<1x128xf32>
    %c0_22 = arith.constant 0 : index
    %c0_23 = arith.constant 0 : index
    %11 = vector.load %arg12[%c0_22, %c0_23] : memref<128x32xbf16, #tpu.memory_space<vmem>>, vector<128x32xbf16>
    %c0_24 = arith.constant 0 : index
    %c0_25 = arith.constant 0 : index
    %12 = vector.load %arg13[%c0_24, %c0_25] : memref<1x32xf32, #tpu.memory_space<vmem>>, vector<1x32xf32>
    %13 = vector.shape_cast %0 : vector<1x8x32xf32> to vector<8x32xf32>
    %cst = arith.constant dense<0.000000e+00> : vector<8xf32>
    %14 = vector.multi_reduction <add>, %13, %cst [1] : vector<8x32xf32> to vector<8xf32>
    %15 = vector.shape_cast %14 : vector<8xf32> to vector<8x1xf32>
    %cst_26 = arith.constant 3.200000e+01 : f32
    %16 = vector.broadcast %cst_26 : f32 to vector<8x1xf32>
    %17 = arith.divf %15, %16 : vector<8x1xf32>
    %18 = vector.broadcast %17 : vector<8x1xf32> to vector<8x32xf32>
    %19 = arith.subf %13, %18 : vector<8x32xf32>
    %20 = arith.mulf %19, %19 : vector<8x32xf32>
    %cst_27 = arith.constant dense<0.000000e+00> : vector<8xf32>
    %21 = vector.multi_reduction <add>, %20, %cst_27 [1] : vector<8x32xf32> to vector<8xf32>
    %22 = vector.shape_cast %21 : vector<8xf32> to vector<8x1xf32>
    %cst_28 = arith.constant 3.200000e+01 : f32
    %23 = vector.broadcast %cst_28 : f32 to vector<8x1xf32>
    %24 = arith.divf %22, %23 : vector<8x1xf32>
    %cst_29 = arith.constant 9.99999974E-6 : f32
    %25 = vector.broadcast %cst_29 : f32 to vector<8x1xf32>
    %26 = arith.addf %24, %25 : vector<8x1xf32>
    %27 = math.rsqrt %26 : vector<8x1xf32>
    %28 = vector.broadcast %27 : vector<8x1xf32> to vector<8x32xf32>
    %29 = arith.mulf %19, %28 : vector<8x32xf32>
    %30 = vector.broadcast %1 : vector<1x32xf32> to vector<8x32xf32>
    %31 = arith.mulf %29, %30 : vector<8x32xf32>
    %32 = vector.broadcast %2 : vector<1x32xf32> to vector<8x32xf32>
    %33 = arith.addf %31, %32 : vector<8x32xf32>
    %34 = arith.truncf %33 : vector<8x32xf32> to vector<8x32xbf16>
    %cst_30 = arith.constant dense<0.000000e+00> : vector<8x96xf32>
    %35 = tpu.matmul %34, %3, %cst_30 {dimension_numbers = #tpu.dot_dimension_numbers<[1], [0], [0], [1], [0, 0, 1, 1], [], []>} : vector<8x32xbf16>, vector<32x96xbf16>, vector<8x96xf32> -> vector<8x96xf32>
    %36 = vector.broadcast %4 : vector<1x96xf32> to vector<8x96xf32>
    %37 = arith.addf %35, %36 : vector<8x96xf32>
    %38 = vector.extract_strided_slice %37 {offsets = [0, 0], sizes = [8, 8], strides = [1, 1]} : vector<8x96xf32> to vector<8x8xf32>
    %39 = vector.shape_cast %38 : vector<8x8xf32> to vector<1x8x8xf32>
    %40 = arith.truncf %39 : vector<1x8x8xf32> to vector<1x8x8xbf16>
    %41 = vector.extract_strided_slice %37 {offsets = [0, 32], sizes = [8, 8], strides = [1, 1]} : vector<8x96xf32> to vector<8x8xf32>
    %42 = vector.shape_cast %41 : vector<8x8xf32> to vector<1x8x8xf32>
    %43 = arith.truncf %42 : vector<1x8x8xf32> to vector<1x8x8xbf16>
    %44 = vector.extract_strided_slice %37 {offsets = [0, 64], sizes = [8, 8], strides = [1, 1]} : vector<8x96xf32> to vector<8x8xf32>
    %45 = vector.shape_cast %44 : vector<8x8xf32> to vector<1x8x8xf32>
    %46 = arith.truncf %45 : vector<1x8x8xf32> to vector<1x8x8xbf16>
    "tpu.trace_start"() <{level = 10 : i32, message = "bqd,bkd->bqk"}> : () -> ()
    %cst_31 = arith.constant dense<0.000000e+00> : vector<1x8x8xf32>
    %47 = tpu.matmul %40, %43, %cst_31 {dimension_numbers = #tpu.dot_dimension_numbers<[2], [2], [1], [1], [0, 0, 0, 1, 1, 1], [0], [0]>} : vector<1x8x8xbf16>, vector<1x8x8xbf16>, vector<1x8x8xf32> -> vector<1x8x8xf32>
    "tpu.trace_stop"() : () -> ()
    %cst_32 = arith.constant dense<0xFF800000> : vector<1x8xf32>
    %48 = vector.multi_reduction <maximumf>, %47, %cst_32 [2] : vector<1x8x8xf32> to vector<1x8xf32>
    %49 = vector.shape_cast %48 : vector<1x8xf32> to vector<1x8x1xf32>
    %50 = vector.broadcast %49 : vector<1x8x1xf32> to vector<1x8x8xf32>
    %51 = arith.subf %47, %50 : vector<1x8x8xf32>
    %52 = math.exp %51 : vector<1x8x8xf32>
    %cst_33 = arith.constant dense<0.000000e+00> : vector<1x8xf32>
    %53 = vector.multi_reduction <add>, %52, %cst_33 [2] : vector<1x8x8xf32> to vector<1x8xf32>
    %54 = vector.shape_cast %53 : vector<1x8xf32> to vector<1x8x1xf32>
    %55 = vector.broadcast %54 : vector<1x8x1xf32> to vector<1x8x8xf32>
    %56 = arith.divf %52, %55 : vector<1x8x8xf32>
    %57 = arith.truncf %56 : vector<1x8x8xf32> to vector<1x8x8xbf16>
    "tpu.trace_start"() <{level = 10 : i32, message = "bqk,bkd->bqd"}> : () -> ()
    %cst_34 = arith.constant dense<0.000000e+00> : vector<1x8x8xf32>
    %58 = tpu.matmul %57, %46, %cst_34 {dimension_numbers = #tpu.dot_dimension_numbers<[2], [1], [1], [2], [0, 0, 0, 1, 1, 2], [0], [0]>} : vector<1x8x8xbf16>, vector<1x8x8xbf16>, vector<1x8x8xf32> -> vector<1x8x8xf32>
    "tpu.trace_stop"() : () -> ()
    %59 = vector.extract_strided_slice %37 {offsets = [0, 8], sizes = [8, 8], strides = [1, 1]} : vector<8x96xf32> to vector<8x8xf32>
    %60 = vector.shape_cast %59 : vector<8x8xf32> to vector<1x8x8xf32>
    %61 = arith.truncf %60 : vector<1x8x8xf32> to vector<1x8x8xbf16>
    %62 = vector.extract_strided_slice %37 {offsets = [0, 40], sizes = [8, 8], strides = [1, 1]} : vector<8x96xf32> to vector<8x8xf32>
    %63 = vector.shape_cast %62 : vector<8x8xf32> to vector<1x8x8xf32>
    %64 = arith.truncf %63 : vector<1x8x8xf32> to vector<1x8x8xbf16>
    %65 = vector.extract_strided_slice %37 {offsets = [0, 72], sizes = [8, 8], strides = [1, 1]} : vector<8x96xf32> to vector<8x8xf32>
    %66 = vector.shape_cast %65 : vector<8x8xf32> to vector<1x8x8xf32>
    %67 = arith.truncf %66 : vector<1x8x8xf32> to vector<1x8x8xbf16>
    "tpu.trace_start"() <{level = 10 : i32, message = "bqd,bkd->bqk"}> : () -> ()
    %cst_35 = arith.constant dense<0.000000e+00> : vector<1x8x8xf32>
    %68 = tpu.matmul %61, %64, %cst_35 {dimension_numbers = #tpu.dot_dimension_numbers<[2], [2], [1], [1], [0, 0, 0, 1, 1, 1], [0], [0]>} : vector<1x8x8xbf16>, vector<1x8x8xbf16>, vector<1x8x8xf32> -> vector<1x8x8xf32>
    "tpu.trace_stop"() : () -> ()
    %cst_36 = arith.constant dense<0xFF800000> : vector<1x8xf32>
    %69 = vector.multi_reduction <maximumf>, %68, %cst_36 [2] : vector<1x8x8xf32> to vector<1x8xf32>
    %70 = vector.shape_cast %69 : vector<1x8xf32> to vector<1x8x1xf32>
    %71 = vector.broadcast %70 : vector<1x8x1xf32> to vector<1x8x8xf32>
    %72 = arith.subf %68, %71 : vector<1x8x8xf32>
    %73 = math.exp %72 : vector<1x8x8xf32>
    %cst_37 = arith.constant dense<0.000000e+00> : vector<1x8xf32>
    %74 = vector.multi_reduction <add>, %73, %cst_37 [2] : vector<1x8x8xf32> to vector<1x8xf32>
    %75 = vector.shape_cast %74 : vector<1x8xf32> to vector<1x8x1xf32>
    %76 = vector.broadcast %75 : vector<1x8x1xf32> to vector<1x8x8xf32>
    %77 = arith.divf %73, %76 : vector<1x8x8xf32>
    %78 = arith.truncf %77 : vector<1x8x8xf32> to vector<1x8x8xbf16>
    "tpu.trace_start"() <{level = 10 : i32, message = "bqk,bkd->bqd"}> : () -> ()
    %cst_38 = arith.constant dense<0.000000e+00> : vector<1x8x8xf32>
    %79 = tpu.matmul %78, %67, %cst_38 {dimension_numbers = #tpu.dot_dimension_numbers<[2], [1], [1], [2], [0, 0, 0, 1, 1, 2], [0], [0]>} : vector<1x8x8xbf16>, vector<1x8x8xbf16>, vector<1x8x8xf32> -> vector<1x8x8xf32>
    "tpu.trace_stop"() : () -> ()
    %80 = vector.extract_strided_slice %37 {offsets = [0, 16], sizes = [8, 8], strides = [1, 1]} : vector<8x96xf32> to vector<8x8xf32>
    %81 = vector.shape_cast %80 : vector<8x8xf32> to vector<1x8x8xf32>
    %82 = arith.truncf %81 : vector<1x8x8xf32> to vector<1x8x8xbf16>
    %83 = vector.extract_strided_slice %37 {offsets = [0, 48], sizes = [8, 8], strides = [1, 1]} : vector<8x96xf32> to vector<8x8xf32>
    %84 = vector.shape_cast %83 : vector<8x8xf32> to vector<1x8x8xf32>
    %85 = arith.truncf %84 : vector<1x8x8xf32> to vector<1x8x8xbf16>
    %86 = vector.extract_strided_slice %37 {offsets = [0, 80], sizes = [8, 8], strides = [1, 1]} : vector<8x96xf32> to vector<8x8xf32>
    %87 = vector.shape_cast %86 : vector<8x8xf32> to vector<1x8x8xf32>
    %88 = arith.truncf %87 : vector<1x8x8xf32> to vector<1x8x8xbf16>
    "tpu.trace_start"() <{level = 10 : i32, message = "bqd,bkd->bqk"}> : () -> ()
    %cst_39 = arith.constant dense<0.000000e+00> : vector<1x8x8xf32>
    %89 = tpu.matmul %82, %85, %cst_39 {dimension_numbers = #tpu.dot_dimension_numbers<[2], [2], [1], [1], [0, 0, 0, 1, 1, 1], [0], [0]>} : vector<1x8x8xbf16>, vector<1x8x8xbf16>, vector<1x8x8xf32> -> vector<1x8x8xf32>
    "tpu.trace_stop"() : () -> ()
    %cst_40 = arith.constant dense<0xFF800000> : vector<1x8xf32>
    %90 = vector.multi_reduction <maximumf>, %89, %cst_40 [2] : vector<1x8x8xf32> to vector<1x8xf32>
    %91 = vector.shape_cast %90 : vector<1x8xf32> to vector<1x8x1xf32>
    %92 = vector.broadcast %91 : vector<1x8x1xf32> to vector<1x8x8xf32>
    %93 = arith.subf %89, %92 : vector<1x8x8xf32>
    %94 = math.exp %93 : vector<1x8x8xf32>
    %cst_41 = arith.constant dense<0.000000e+00> : vector<1x8xf32>
    %95 = vector.multi_reduction <add>, %94, %cst_41 [2] : vector<1x8x8xf32> to vector<1x8xf32>
    %96 = vector.shape_cast %95 : vector<1x8xf32> to vector<1x8x1xf32>
    %97 = vector.broadcast %96 : vector<1x8x1xf32> to vector<1x8x8xf32>
    %98 = arith.divf %94, %97 : vector<1x8x8xf32>
    %99 = arith.truncf %98 : vector<1x8x8xf32> to vector<1x8x8xbf16>
    "tpu.trace_start"() <{level = 10 : i32, message = "bqk,bkd->bqd"}> : () -> ()
    %cst_42 = arith.constant dense<0.000000e+00> : vector<1x8x8xf32>
    %100 = tpu.matmul %99, %88, %cst_42 {dimension_numbers = #tpu.dot_dimension_numbers<[2], [1], [1], [2], [0, 0, 0, 1, 1, 2], [0], [0]>} : vector<1x8x8xbf16>, vector<1x8x8xbf16>, vector<1x8x8xf32> -> vector<1x8x8xf32>
    "tpu.trace_stop"() : () -> ()
    %101 = vector.extract_strided_slice %37 {offsets = [0, 24], sizes = [8, 8], strides = [1, 1]} : vector<8x96xf32> to vector<8x8xf32>
    %102 = vector.shape_cast %101 : vector<8x8xf32> to vector<1x8x8xf32>
    %103 = arith.truncf %102 : vector<1x8x8xf32> to vector<1x8x8xbf16>
    %104 = vector.extract_strided_slice %37 {offsets = [0, 56], sizes = [8, 8], strides = [1, 1]} : vector<8x96xf32> to vector<8x8xf32>
    %105 = vector.shape_cast %104 : vector<8x8xf32> to vector<1x8x8xf32>
    %106 = arith.truncf %105 : vector<1x8x8xf32> to vector<1x8x8xbf16>
    %107 = vector.extract_strided_slice %37 {offsets = [0, 88], sizes = [8, 8], strides = [1, 1]} : vector<8x96xf32> to vector<8x8xf32>
    %108 = vector.shape_cast %107 : vector<8x8xf32> to vector<1x8x8xf32>
    %109 = arith.truncf %108 : vector<1x8x8xf32> to vector<1x8x8xbf16>
    "tpu.trace_start"() <{level = 10 : i32, message = "bqd,bkd->bqk"}> : () -> ()
    %cst_43 = arith.constant dense<0.000000e+00> : vector<1x8x8xf32>
    %110 = tpu.matmul %103, %106, %cst_43 {dimension_numbers = #tpu.dot_dimension_numbers<[2], [2], [1], [1], [0, 0, 0, 1, 1, 1], [0], [0]>} : vector<1x8x8xbf16>, vector<1x8x8xbf16>, vector<1x8x8xf32> -> vector<1x8x8xf32>
    "tpu.trace_stop"() : () -> ()
    %cst_44 = arith.constant dense<0xFF800000> : vector<1x8xf32>
    %111 = vector.multi_reduction <maximumf>, %110, %cst_44 [2] : vector<1x8x8xf32> to vector<1x8xf32>
    %112 = vector.shape_cast %111 : vector<1x8xf32> to vector<1x8x1xf32>
    %113 = vector.broadcast %112 : vector<1x8x1xf32> to vector<1x8x8xf32>
    %114 = arith.subf %110, %113 : vector<1x8x8xf32>
    %115 = math.exp %114 : vector<1x8x8xf32>
    %cst_45 = arith.constant dense<0.000000e+00> : vector<1x8xf32>
    %116 = vector.multi_reduction <add>, %115, %cst_45 [2] : vector<1x8x8xf32> to vector<1x8xf32>
    %117 = vector.shape_cast %116 : vector<1x8xf32> to vector<1x8x1xf32>
    %118 = vector.broadcast %117 : vector<1x8x1xf32> to vector<1x8x8xf32>
    %119 = arith.divf %115, %118 : vector<1x8x8xf32>
    %120 = arith.truncf %119 : vector<1x8x8xf32> to vector<1x8x8xbf16>
    "tpu.trace_start"() <{level = 10 : i32, message = "bqk,bkd->bqd"}> : () -> ()
    %cst_46 = arith.constant dense<0.000000e+00> : vector<1x8x8xf32>
    %121 = tpu.matmul %120, %109, %cst_46 {dimension_numbers = #tpu.dot_dimension_numbers<[2], [1], [1], [2], [0, 0, 0, 1, 1, 2], [0], [0]>} : vector<1x8x8xbf16>, vector<1x8x8xbf16>, vector<1x8x8xf32> -> vector<1x8x8xf32>
    "tpu.trace_stop"() : () -> ()
    %122 = tpu.concatenate %58, %79, %100, %121 in 2 : vector<1x8x8xf32>, vector<1x8x8xf32>, vector<1x8x8xf32>, vector<1x8x8xf32> -> vector<1x8x32xf32>
    %123 = vector.shape_cast %122 : vector<1x8x32xf32> to vector<8x32xf32>
    %124 = arith.truncf %123 : vector<8x32xf32> to vector<8x32xbf16>
    %cst_47 = arith.constant dense<0.000000e+00> : vector<8x32xf32>
    %125 = tpu.matmul %124, %5, %cst_47 {dimension_numbers = #tpu.dot_dimension_numbers<[1], [0], [0], [1], [0, 0, 1, 1], [], []>} : vector<8x32xbf16>, vector<32x32xbf16>, vector<8x32xf32> -> vector<8x32xf32>
    %126 = vector.broadcast %6 : vector<1x32xf32> to vector<8x32xf32>
    %127 = arith.addf %125, %126 : vector<8x32xf32>
    %128 = arith.addf %13, %127 : vector<8x32xf32>
    %cst_48 = arith.constant dense<0.000000e+00> : vector<8xf32>
    %129 = vector.multi_reduction <add>, %128, %cst_48 [1] : vector<8x32xf32> to vector<8xf32>
    %130 = vector.shape_cast %129 : vector<8xf32> to vector<8x1xf32>
    %cst_49 = arith.constant 3.200000e+01 : f32
    %131 = vector.broadcast %cst_49 : f32 to vector<8x1xf32>
    %132 = arith.divf %130, %131 : vector<8x1xf32>
    %133 = vector.broadcast %132 : vector<8x1xf32> to vector<8x32xf32>
    %134 = arith.subf %128, %133 : vector<8x32xf32>
    %135 = arith.mulf %134, %134 : vector<8x32xf32>
    %cst_50 = arith.constant dense<0.000000e+00> : vector<8xf32>
    %136 = vector.multi_reduction <add>, %135, %cst_50 [1] : vector<8x32xf32> to vector<8xf32>
    %137 = vector.shape_cast %136 : vector<8xf32> to vector<8x1xf32>
    %cst_51 = arith.constant 3.200000e+01 : f32
    %138 = vector.broadcast %cst_51 : f32 to vector<8x1xf32>
    %139 = arith.divf %137, %138 : vector<8x1xf32>
    %cst_52 = arith.constant 9.99999974E-6 : f32
    %140 = vector.broadcast %cst_52 : f32 to vector<8x1xf32>
    %141 = arith.addf %139, %140 : vector<8x1xf32>
    %142 = math.rsqrt %141 : vector<8x1xf32>
    %143 = vector.broadcast %142 : vector<8x1xf32> to vector<8x32xf32>
    %144 = arith.mulf %134, %143 : vector<8x32xf32>
    %145 = vector.broadcast %7 : vector<1x32xf32> to vector<8x32xf32>
    %146 = arith.mulf %144, %145 : vector<8x32xf32>
    %147 = vector.broadcast %8 : vector<1x32xf32> to vector<8x32xf32>
    %148 = arith.addf %146, %147 : vector<8x32xf32>
    %149 = arith.truncf %148 : vector<8x32xf32> to vector<8x32xbf16>
    %cst_53 = arith.constant dense<0.000000e+00> : vector<8x128xf32>
    %150 = tpu.matmul %149, %9, %cst_53 {dimension_numbers = #tpu.dot_dimension_numbers<[1], [0], [0], [1], [0, 0, 1, 1], [], []>} : vector<8x32xbf16>, vector<32x128xbf16>, vector<8x128xf32> -> vector<8x128xf32>
    %151 = vector.broadcast %10 : vector<1x128xf32> to vector<8x128xf32>
    %152 = arith.addf %150, %151 : vector<8x128xf32>
    %cst_54 = arith.constant 0.000000e+00 : f32
    %153 = vector.broadcast %cst_54 : f32 to vector<8x128xf32>
    %154 = arith.maximumf %152, %153 : vector<8x128xf32>
    %155 = arith.truncf %154 : vector<8x128xf32> to vector<8x128xbf16>
    %cst_55 = arith.constant dense<0.000000e+00> : vector<8x32xf32>
    %156 = tpu.matmul %155, %11, %cst_55 {dimension_numbers = #tpu.dot_dimension_numbers<[1], [0], [0], [1], [0, 0, 1, 1], [], []>} : vector<8x128xbf16>, vector<128x32xbf16>, vector<8x32xf32> -> vector<8x32xf32>
    %157 = vector.broadcast %12 : vector<1x32xf32> to vector<8x32xf32>
    %158 = arith.addf %156, %157 : vector<8x32xf32>
    %159 = arith.addf %128, %158 : vector<8x32xf32>
    %160 = vector.shape_cast %159 : vector<8x32xf32> to vector<1x8x32xf32>
    %c0_56 = arith.constant 0 : index
    %c0_57 = arith.constant 0 : index
    %c0_58 = arith.constant 0 : index
    %161 = vector.load %arg14[%c0_56, %c0_57, %c0_58] : memref<1x8x32xf32, #tpu.memory_space<vmem>>, vector<1x8x32xf32>
    tpu.vector_store %arg14[%c0_56, %c0_57, %c0_58], %160 {strides = array<i32>} : memref<1x8x32xf32, #tpu.memory_space<vmem>>, vector<1x8x32xf32>,
    return
  }
  func.func @transform_0(%arg0: i32) -> (i32, i32, i32) {
    %c0_i32 = arith.constant 0 : i32
    %c0_i32_0 = arith.constant 0 : i32
    %c0_i32_1 = arith.constant 0 : i32
    return %arg0, %c0_i32, %c0_i32_0 : i32, i32, i32
  }
  func.func @transform_1(%arg0: i32) -> (i32, i32) {
    %c0_i32 = arith.constant 0 : i32
    %c0_i32_0 = arith.constant 0 : i32
    %c0_i32_1 = arith.constant 0 : i32
    return %c0_i32, %c0_i32_0 : i32, i32
  }
  func.func @transform_2(%arg0: i32) -> (i32, i32) {
    %c0_i32 = arith.constant 0 : i32
    %c0_i32_0 = arith.constant 0 : i32
    %c0_i32_1 = arith.constant 0 : i32
    return %c0_i32, %c0_i32_0 : i32, i32
  }
  func.func @transform_3(%arg0: i32) -> (i32, i32) {
    %c0_i32 = arith.constant 0 : i32
    %c0_i32_0 = arith.constant 0 : i32
    %c0_i32_1 = arith.constant 0 : i32
    return %c0_i32, %c0_i32_0 : i32, i32
  }
  func.func @transform_4(%arg0: i32) -> (i32, i32) {
    %c0_i32 = arith.constant 0 : i32
    %c0_i32_0 = arith.constant 0 : i32
    %c0_i32_1 = arith.constant 0 : i32
    return %c0_i32, %c0_i32_0 : i32, i32
  }
  func.func @transform_5(%arg0: i32) -> (i32, i32) {
    %c0_i32 = arith.constant 0 : i32
    %c0_i32_0 = arith.constant 0 : i32
    %c0_i32_1 = arith.constant 0 : i32
    return %c0_i32, %c0_i32_0 : i32, i32
  }
  func.func @transform_6(%arg0: i32) -> (i32, i32) {
    %c0_i32 = arith.constant 0 : i32
    %c0_i32_0 = arith.constant 0 : i32
    %c0_i32_1 = arith.constant 0 : i32
    return %c0_i32, %c0_i32_0 : i32, i32
  }
  func.func @transform_7(%arg0: i32) -> (i32, i32) {
    %c0_i32 = arith.constant 0 : i32
    %c0_i32_0 = arith.constant 0 : i32
    %c0_i32_1 = arith.constant 0 : i32
    return %c0_i32, %c0_i32_0 : i32, i32
  }
  func.func @transform_8(%arg0: i32) -> (i32, i32) {
    %c0_i32 = arith.constant 0 : i32
    %c0_i32_0 = arith.constant 0 : i32
    %c0_i32_1 = arith.constant 0 : i32
    return %c0_i32, %c0_i32_0 : i32, i32
  }
  func.func @transform_9(%arg0: i32) -> (i32, i32) {
    %c0_i32 = arith.constant 0 : i32
    %c0_i32_0 = arith.constant 0 : i32
    %c0_i32_1 = arith.constant 0 : i32
    return %c0_i32, %c0_i32_0 : i32, i32
  }
  func.func @transform_10(%arg0: i32) -> (i32, i32) {
    %c0_i32 = arith.constant 0 : i32
    %c0_i32_0 = arith.constant 0 : i32
    %c0_i32_1 = arith.constant 0 : i32
    return %c0_i32, %c0_i32_0 : i32, i32
  }
  func.func @transform_11(%arg0: i32) -> (i32, i32) {
    %c0_i32 = arith.constant 0 : i32
    %c0_i32_0 = arith.constant 0 : i32
    %c0_i32_1 = arith.constant 0 : i32
    return %c0_i32, %c0_i32_0 : i32, i32
  }
  func.func @transform_12(%arg0: i32) -> (i32, i32) {
    %c0_i32 = arith.constant 0 : i32
    %c0_i32_0 = arith.constant 0 : i32
    %c0_i32_1 = arith.constant 0 : i32
    return %c0_i32, %c0_i32_0 : i32, i32
  }
  func.func @transform_13(%arg0: i32) -> (i32, i32, i32) {
    %c0_i32 = arith.constant 0 : i32
    %c0_i32_0 = arith.constant 0 : i32
    %c0_i32_1 = arith.constant 0 : i32
    return %arg0, %c0_i32, %c0_i32_0 : i32, i32, i32
  }
}

</mosaic_0001>

<bundles_post_ra>
// kernel: tpu_custom_call.1
= control target key start
LH: loop header
LB: loop body
LE: loop exit
PB: predicated region body
PF: predicated region fallthrough
CT: control target
= control target key end

     0   :  { %s3184_s0 = inlined_call_operand.hbm [shape: f32[2,8,32], index: 0, kind: input, shape index: {}]   ;;  %s3185_s1 = inlined_call_operand.hbm [shape: f32[1,32], index: 1, kind: input, shape index: {}]   ;;  %s3186_s2 = inlined_call_operand.hbm [shape: f32[1,32], index: 2, kind: input, shape index: {}]   ;;  %s3187_s3 = inlined_call_operand.hbm [shape: bf16[32,96], index: 3, kind: input, shape index: {}]   ;;  %s3188_s4 = inlined_call_operand.hbm [shape: f32[1,96], index: 4, kind: input, shape index: {}]   ;;  %s3189_s5 = inlined_call_operand.hbm [shape: bf16[32,32], index: 5, kind: input, shape index: {}]   ;;  %s3190_s6 = inlined_call_operand.hbm [shape: f32[1,32], index: 6, kind: input, shape index: {}]   ;;  %s3191_s7 = inlined_call_operand.hbm [shape: f32[1,32], index: 7, kind: input, shape index: {}]   ;;  %s3192_s8 = inlined_call_operand.hbm [shape: f32[1,32], index: 8, kind: input, shape index: {}]   ;;  %s3193_s9 = inlined_call_operand.hbm [shape: bf16[32,128], index: 9, kind: input, shape index: {}]   ;;  %s3194_s10 = inlined_call_operand.hbm [shape: f32[1,128], index: 10, kind: input, shape index: {}]   ;;  %s3195_s11 = inlined_call_operand.hbm [shape: bf16[128,32], index: 11, kind: input, shape index: {}]   ;;  %s3196_s12 = inlined_call_operand.hbm [shape: f32[1,32], index: 12, kind: input, shape index: {}]   ;;  %s3197_s13 = inlined_call_operand.hbm [shape: f32[2,8,32], index: 13, kind: output, shape index: {}]  }
   0x1   :  { %3207 = sst [smem:[#allocation34_spill]] %s3184_s0 }
   0x2   :  { %3208 = sst [smem:[#allocation35_spill]] %s3185_s1 }
   0x3   :  { %3209 = sst [smem:[#allocation36_spill]] %s3186_s2 }
   0x4   :  { %3210 = sst [smem:[#allocation37_spill]] %s3187_s3 }
   0x5   :  { %3211 = sst [smem:[#allocation38_spill]] %s3197_s13 }
   0x6   :  { %18 = vsyncpa [#allocation3], 0 }
   0x7   :  { %20 = vsyncpa [#allocation3 + $0x1], 0 }
   0x8   :  { %21 = vsyncpa [#allocation6], 0 }
   0x9   :  { %22 = vsyncpa [#allocation9], 0 }
   0xa   :  { %23 = vsyncpa [#allocation12], 0 }
   0xb   :  { %24 = vsyncpa [#allocation15], 0 }
   0xc   :  { %25 = vsyncpa [#allocation18], 0 }
   0xd   :  { %26 = vsyncpa [#allocation21], 0 }
   0xe   :  { %27 = vsyncpa [#allocation4], 0 }
   0xf   :  { %29 = vsyncpa [#allocation4 + $0x1], 0  ;;  %s2624_s25 = smov 0   ;;  %s2626_s26 = smov 0  }
  0x10   :  { %s2628_s27 = smov 0   ;;  %s2630_s28 = smov 0  }
  0x11 LB: > { %s2522_s29 = smov [#allocation5]   ;;  %s2645_s14 = sadd.s32 4294967295, %s2520_s28   ;;  %s2520_s28 = sphi %s2630_s28, %s3250_s28   ;;  %s2516_s27 = sphi %s2628_s27, %s3249_s27   ;;  %s2512_s26 = sphi %s2626_s26, %s3248_s26   ;;  %s2508_s25 = sphi %s2624_s25, %s3247_s25  }
  0x12   : > { %s357_s30 = sshll.u32 %s2522_s29, 4  ;;  %3212 = sst [smem:[#allocation32_spill]] %s2645_s14  ;;  %s2650_s30 = int_to_ptr.vmem [resolvable:$true] %s357_s30 }
  0x13   : > { %p1651_p0 = scmp.ge.s32.totalorder %s2520_s28, 1  ;;  %p3204_p1 = scmp.eq.s32.totalorder %s2645_s14, 0 }
  0x14   : > { %p344_p2 = scmp.lt.s32.totalorder %s2520_s28, 3  ;;  %s2523_s16 = smov [#allocation8]  }
  0x15   : > { %s378_s17 = sshll.u32 %s2523_s16, 4  ;;  %s2524_s19 = smov [#allocation11]   ;;  %s2659_s17 = int_to_ptr.vmem [resolvable:$true] %s378_s17 }
  0x16   : > { %p2652_p3 = pnand %p1651_p0, %p344_p2  ;;  %s402_s20 = sshll.u32 %s2524_s19, 4  ;;  %s2667_s20 = int_to_ptr.vmem [resolvable:$true] %s402_s20 }
  0x17   : > { %s3216_s1 = sld [smem:[#allocation35_spill]] }
  0x18   : > { %s3213_s15 = scalar_select %p2652_p3, 1, 0 }
  0x19   : > { %p1897_p5 = pneg %p2652_p3 }
  0x1a   : > { %3214 = sst [smem:[#allocation33_spill]] %s3213_s15 }
  0x1b   : > { %p2663_p6 = pnand %p1897_p5, %p3204_p1 }
  0x1d   : > { %s2064_s23 = scalar_lea.hbm %s3216_s1, 16  ;;  %p2677_p8 = pneg %p2663_p6 }
  0x1e   : > { %p2065_p7 = scmp.ne.s32.totalorder %s3216_s1, %s2064_s23  ;;  %p2071_p11 = scmp.lt.u32.totalorder %s2064_s23, %s3216_s1 }
  0x20   : > { %p2067_p9 = pnand %p2677_p8, %p2065_p7 }
  0x22   : > { %p2068_p10 = pneg %p2067_p9 }
  0x24   : > { %p2073_p12 = pnand %p2071_p11, %p2068_p10 }
  0x26   : > { %2076 = shalt.err (!%p2073_p12)
}
  0x27   : > { %s2077_s21 = scalar_lea.vmem %s2650_s30, 16  ;;  %s2084_s22 = scalar_lea.vmem %s2650_s30, 32 }
  0x28   : > { %p2078_p13 = scmp.ne.s32.totalorder %s2650_s30, %s2077_s21  ;;  %p2085_p5 = scmp.lt.s32.totalorder %s2650_s30, %s2650_s30 }
  0x29   : > { %p2086_p7 = scmp.lt.s32.totalorder %s2084_s22, %s2077_s21 }
  0x2a   : > { %p2080_p0 = pnand %p2078_p13, %p2677_p8 }
  0x2b   : > { %p2087_p9 = por %p2086_p7, %p2085_p5 }
  0x2c   : > { %p2081_p2 = pneg %p2080_p0 }
  0x2e   : > { %p2088_p4 = pnand %p2087_p9, %p2081_p2 }
  0x30   : > { %2091 = shalt.err (!%p2088_p4)
}
  0x31   : > { %1900 = dma.hbm_to_vmem [thread:$0]  (!%p2663_p6), %s3216_s1, 16, %s2650_s30, [#allocation6]  }
  0x32   : > { %s3218_s3 = sld [smem:[#allocation37_spill]] }
  0x38   : > { %s2092_s19 = scalar_lea.hbm %s3218_s3, 256 }
  0x39   : > { %p2093_p10 = scmp.ne.s32.totalorder %s3218_s3, %s2092_s19  ;;  %p2099_p4 = scmp.lt.u32.totalorder %s2092_s19, %s3218_s3 }
  0x3b   : > { %p2095_p11 = pnand %p2093_p10, %p2677_p8 }
  0x3d   : > { %p2096_p12 = pneg %p2095_p11 }
  0x3f   : > { %p2101_p13 = pnand %p2099_p4, %p2096_p12 }
  0x41   : > { %2104 = shalt.err (!%p2101_p13)
}
  0x42   : > { %s2105_s30 = scalar_lea.vmem %s2659_s17, 256  ;;  %p2113_p7 = scmp.lt.s32.totalorder %s2659_s17, %s2659_s17 }
  0x43   : > { %p2106_p0 = scmp.ne.s32.totalorder %s2659_s17, %s2105_s30  ;;  %p2114_p9 = scmp.lt.s32.totalorder %s2105_s30, %s2105_s30 }
  0x45   : > { %p2108_p2 = pnand %p2106_p0, %p2677_p8  ;;  %p2115_p10 = por %p2114_p9, %p2113_p7 }
  0x47   : > { %p2109_p5 = pneg %p2108_p2 }
  0x49   : > { %p2116_p11 = pnand %p2115_p10, %p2109_p5 }
  0x4b   : > { %2119 = shalt.err (!%p2116_p11)
}
  0x4c   : > { %s2525_s0 = smov 64   ;;  %s2526_s15 = smov 4  }
  0x4d   : > { %1906 = dma.hbm_to_vmem [thread:$0]  (!%p2663_p6), %s3218_s3, 256, %s2659_s17, [#allocation9], %s2525_s0, %s2525_s0, %s2526_s15  }
  0x4e   : > { %s2120_s19 = scalar_lea.hbm %s3189_s5, 256 }
  0x4f   : > { %p2121_p12 = scmp.ne.s32.totalorder %s3189_s5, %s2120_s19  ;;  %p2127_p0 = scmp.lt.u32.totalorder %s2120_s19, %s3189_s5 }
  0x51   : > { %p2123_p4 = pnand %p2121_p12, %p2677_p8 }
  0x53   : > { %p2124_p13 = pneg %p2123_p4 }
  0x55   : > { %p2129_p2 = pnand %p2127_p0, %p2124_p13 }
  0x57   : > { %2132 = shalt.err (!%p2129_p2)
}
  0x58   : > { %s2133_s17 = scalar_lea.vmem %s2667_s20, 256  ;;  %p2141_p10 = scmp.lt.s32.totalorder %s2667_s20, %s2667_s20 }
  0x59   : > { %p2134_p5 = scmp.ne.s32.totalorder %s2667_s20, %s2133_s17  ;;  %p2142_p11 = scmp.lt.s32.totalorder %s2133_s17, %s2133_s17 }
  0x5b   : > { %p2136_p7 = pnand %p2134_p5, %p2677_p8  ;;  %p2143_p12 = por %p2142_p11, %p2141_p10 }
  0x5d   : > { %p2137_p9 = pneg %p2136_p7 }
  0x5f   : > { %p2144_p4 = pnand %p2143_p12, %p2137_p9 }
  0x61   : > { %2147 = shalt.err (!%p2144_p4)
}
  0x62   : > { %1912 = dma.hbm_to_vmem [thread:$0]  (!%p2663_p6), %s3189_s5, 256, %s2667_s20, [#allocation12], %s2525_s0, %s2525_s0, %s2526_s15  }
  0x63   : > { %s2527_s23 = smov [#allocation14]   ;;  %s2528_s29 = smov [#allocation17]  }
  0x64   : > { %s427_s24 = sshll.u32 %s2527_s23, 4  ;;  %s448_s19 = sshll.u32 %s2528_s29, 4  ;;  %s428_s24 = int_to_ptr.vmem [resolvable:$true] %s427_s24  ;;  %s449_s19 = int_to_ptr.vmem [resolvable:$true] %s448_s19 }
  0x65   : > { %s2148_s30 = scalar_lea.hbm %s3191_s7, 16 }
  0x66   : > { %p2149_p13 = scmp.ne.s32.totalorder %s3191_s7, %s2148_s30  ;;  %p2155_p5 = scmp.lt.u32.totalorder %s2148_s30, %s3191_s7 }
  0x68   : > { %p2151_p0 = pnand %p2149_p13, %p2677_p8 }
  0x6a   : > { %p2152_p2 = pneg %p2151_p0 }
  0x6c   : > { %p2157_p7 = pnand %p2155_p5, %p2152_p2 }
  0x6e   : > { %2160 = shalt.err (!%p2157_p7)
}
  0x6f   : > { %s2161_s20 = scalar_lea.vmem %s428_s24, 16  ;;  %s2168_s13 = scalar_lea.vmem %s428_s24, 32 }
  0x70   : > { %p2162_p9 = scmp.ne.s32.totalorder %s428_s24, %s2161_s20  ;;  %p2169_p12 = scmp.lt.s32.totalorder %s428_s24, %s428_s24 }
  0x71   : > { %p2170_p4 = scmp.lt.s32.totalorder %s2168_s13, %s2161_s20 }
  0x72   : > { %p2164_p10 = pnand %p2162_p9, %p2677_p8 }
  0x73   : > { %p2171_p1 = por %p2170_p4, %p2169_p12 }
  0x74   : > { %p2165_p11 = pneg %p2164_p10 }
  0x76   : > { %p2172_p3 = pnand %p2171_p1, %p2165_p11 }
  0x78   : > { %2175 = shalt.err (!%p2172_p3)
}
  0x79   : > { %1918 = dma.hbm_to_vmem [thread:$0]  (!%p2663_p6), %s3191_s7, 16, %s428_s24, [#allocation15]  }
  0x7a   : > { %s2176_s21 = scalar_lea.hbm %s3193_s9, 256 }
  0x7b   : > { %p2177_p13 = scmp.ne.s32.totalorder %s3193_s9, %s2176_s21  ;;  %p2183_p3 = scmp.lt.u32.totalorder %s2176_s21, %s3193_s9 }
  0x7d   : > { %p2179_p0 = pnand %p2177_p13, %p2677_p8 }
  0x7f   : > { %p2180_p1 = pneg %p2179_p0 }
  0x81   : > { %p2185_p2 = pnand %p2183_p3, %p2180_p1 }
  0x83   : > { %2188 = shalt.err (!%p2185_p2)
}
  0x84   : > { %s2189_s20 = scalar_lea.vmem %s449_s19, 256  ;;  %p2197_p10 = scmp.lt.s32.totalorder %s449_s19, %s449_s19 }
  0x85   : > { %p2190_p5 = scmp.ne.s32.totalorder %s449_s19, %s2189_s20  ;;  %p2198_p11 = scmp.lt.s32.totalorder %s2189_s20, %s2189_s20 }
  0x87   : > { %p2192_p7 = pnand %p2190_p5, %p2677_p8  ;;  %p2199_p12 = por %p2198_p11, %p2197_p10 }
  0x89   : > { %p2193_p9 = pneg %p2192_p7 }
  0x8b   : > { %p2200_p4 = pnand %p2199_p12, %p2193_p9 }
  0x8d   : > { %2203 = shalt.err (!%p2200_p4)
}
  0x8e   : > { %1924 = dma.hbm_to_vmem [thread:$0]  (!%p2663_p6), %s3193_s9, 256, %s449_s19, [#allocation18], %s2525_s0, %s2525_s0, %s2526_s15  }
  0x8f   : > { %s2529_s3 = smov [#allocation20]   ;;  %s2530_s14 = smov [#allocation7]  }
  0x90   : > { %s472_s23 = sshll.u32 %s2529_s3, 4  ;;  %s368_s29 = sshll.u32 %s2530_s14, 4  ;;  %s473_s23 = int_to_ptr.vmem [resolvable:$true] %s472_s23  ;;  %s369_s29 = int_to_ptr.vmem [resolvable:$true] %s368_s29 }
  0x91   : > { %s2204_s30 = scalar_lea.hbm %s3195_s11, 1024 }
  0x92   : > { %p2205_p13 = scmp.ne.s32.totalorder %s3195_s11, %s2204_s30  ;;  %p2211_p3 = scmp.lt.u32.totalorder %s2204_s30, %s3195_s11 }
  0x94   : > { %p2207_p0 = pnand %p2205_p13, %p2677_p8 }
  0x96   : > { %p2208_p1 = pneg %p2207_p0 }
  0x98   : > { %p2213_p2 = pnand %p2211_p3, %p2208_p1 }
  0x9a   : > { %2216 = shalt.err (!%p2213_p2)
}
  0x9b   : > { %s2217_s19 = scalar_lea.vmem %s473_s23, 1024  ;;  %p2225_p10 = scmp.lt.s32.totalorder %s473_s23, %s473_s23 }
  0x9c   : > { %p2218_p5 = scmp.ne.s32.totalorder %s473_s23, %s2217_s19  ;;  %p2226_p11 = scmp.lt.s32.totalorder %s2217_s19, %s2217_s19 }
  0x9e   : > { %p2220_p7 = pnand %p2218_p5, %p2677_p8  ;;  %p2227_p12 = por %p2226_p11, %p2225_p10 }
  0xa0   : > { %p2221_p9 = pneg %p2220_p7 }
  0xa2   : > { %p2228_p4 = pnand %p2227_p12, %p2221_p9 }
  0xa4   : > { %2231 = shalt.err (!%p2228_p4)
}
  0xa5   : > { %1930 = dma.hbm_to_vmem [thread:$0]  (!%p2663_p6), %s3195_s11, 1024, %s473_s23, [#allocation21], %s2525_s0, %s2525_s0, %s2526_s15  }
  0xa6   : > { %s3219_s2 = sld [smem:[#allocation36_spill]] }
  0xac   : > { %s2232_s22 = scalar_lea.hbm %s3219_s2, 16 }
  0xad   : > { %p2233_p13 = scmp.ne.s32.totalorder %s3219_s2, %s2232_s22  ;;  %p2239_p3 = scmp.lt.u32.totalorder %s2232_s22, %s3219_s2 }
  0xaf   : > { %p2235_p0 = pnand %p2233_p13, %p2677_p8 }
  0xb1   : > { %p2236_p1 = pneg %p2235_p0 }
  0xb3   : > { %p2241_p2 = pnand %p2239_p3, %p2236_p1 }
  0xb5   : > { %2244 = shalt.err (!%p2241_p2)
}
  0xb6   : > { %s2245_s24 = scalar_lea.vmem %s369_s29, 16  ;;  %s2252_s0 = scalar_lea.vmem %s369_s29, 32 }
  0xb7   : > { %p2246_p5 = scmp.ne.s32.totalorder %s369_s29, %s2245_s24  ;;  %p2253_p10 = scmp.lt.s32.totalorder %s369_s29, %s369_s29 }
  0xb8   : > { %p2254_p11 = scmp.lt.s32.totalorder %s2252_s0, %s2245_s24 }
  0xb9   : > { %p2248_p7 = pnand %p2246_p5, %p2677_p8 }
  0xba   : > { %p2255_p12 = por %p2254_p11, %p2253_p10 }
  0xbb   : > { %p2249_p9 = pneg %p2248_p7 }
  0xbd   : > { %p2256_p4 = pnand %p2255_p12, %p2249_p9 }
  0xbf   : > { %2259 = shalt.err (!%p2256_p4)
}
  0xc0   : > { %1903 = dma.hbm_to_vmem [thread:$0]  (!%p2663_p6), %s3219_s2, 16, %s369_s29, [#allocation6]  }
  0xc1   : > { %s2531_s19 = smov [#allocation10]   ;;  %s2532_s3 = smov [#allocation13]  }
  0xc2   : > { %s392_s13 = sshll.u32 %s2531_s19, 4  ;;  %s416_s14 = sshll.u32 %s2532_s3, 4  ;;  %s393_s13 = int_to_ptr.vmem [resolvable:$true] %s392_s13  ;;  %s417_s14 = int_to_ptr.vmem [resolvable:$true] %s416_s14 }
  0xc3   : > { %s2260_s30 = scalar_lea.hbm %s3188_s4, 16 }
  0xc4   : > { %p2261_p13 = scmp.ne.s32.totalorder %s3188_s4, %s2260_s30  ;;  %p2267_p3 = scmp.lt.u32.totalorder %s2260_s30, %s3188_s4 }
  0xc6   : > { %p2263_p0 = pnand %p2261_p13, %p2677_p8 }
  0xc8   : > { %p2264_p1 = pneg %p2263_p0 }
  0xca   : > { %p2269_p2 = pnand %p2267_p3, %p2264_p1 }
  0xcc   : > { %2272 = shalt.err (!%p2269_p2)
}
  0xcd   : > { %s2273_s29 = scalar_lea.vmem %s393_s13, 16  ;;  %s2280_s0 = scalar_lea.vmem %s393_s13, 32 }
  0xce   : > { %p2274_p5 = scmp.ne.s32.totalorder %s393_s13, %s2273_s29  ;;  %p2281_p10 = scmp.lt.s32.totalorder %s393_s13, %s393_s13 }
  0xcf   : > { %p2282_p11 = scmp.lt.s32.totalorder %s2280_s0, %s2273_s29 }
  0xd0   : > { %p2276_p7 = pnand %p2274_p5, %p2677_p8 }
  0xd1   : > { %p2283_p12 = por %p2282_p11, %p2281_p10 }
  0xd2   : > { %p2277_p9 = pneg %p2276_p7 }
  0xd4   : > { %p2284_p4 = pnand %p2283_p12, %p2277_p9 }
  0xd6   : > { %2287 = shalt.err (!%p2284_p4)
}
  0xd7   : > { %1909 = dma.hbm_to_vmem [thread:$0]  (!%p2663_p6), %s3188_s4, 16, %s393_s13, [#allocation9]  }
  0xd8   : > { %s2288_s21 = scalar_lea.hbm %s3190_s6, 16 }
  0xd9   : > { %p2289_p13 = scmp.ne.s32.totalorder %s3190_s6, %s2288_s21  ;;  %p2295_p3 = scmp.lt.u32.totalorder %s2288_s21, %s3190_s6 }
  0xdb   : > { %p2291_p0 = pnand %p2289_p13, %p2677_p8 }
  0xdd   : > { %p2292_p1 = pneg %p2291_p0 }
  0xdf   : > { %p2297_p2 = pnand %p2295_p3, %p2292_p1 }
  0xe1   : > { %2300 = shalt.err (!%p2297_p2)
}
  0xe2   : > { %s2301_s20 = scalar_lea.vmem %s417_s14, 16  ;;  %s2308_s13 = scalar_lea.vmem %s417_s14, 32 }
  0xe3   : > { %p2302_p5 = scmp.ne.s32.totalorder %s417_s14, %s2301_s20  ;;  %p2309_p10 = scmp.lt.s32.totalorder %s417_s14, %s417_s14 }
  0xe4   : > { %p2310_p11 = scmp.lt.s32.totalorder %s2308_s13, %s2301_s20 }
  0xe5   : > { %p2304_p7 = pnand %p2302_p5, %p2677_p8 }
  0xe6   : > { %p2311_p12 = por %p2310_p11, %p2309_p10 }
  0xe7   : > { %p2305_p9 = pneg %p2304_p7 }
  0xe9   : > { %p2312_p4 = pnand %p2311_p12, %p2305_p9 }
  0xeb   : > { %2315 = shalt.err (!%p2312_p4)
}
  0xec   : > { %1915 = dma.hbm_to_vmem [thread:$0]  (!%p2663_p6), %s3190_s6, 16, %s417_s14, [#allocation12]  }
  0xed   : > { %s2533_s0 = smov [#allocation16]   ;;  %s2534_s23 = smov [#allocation19]  }
  0xee   : > { %s438_s15 = sshll.u32 %s2533_s0, 4  ;;  %s462_s19 = sshll.u32 %s2534_s23, 4  ;;  %s439_s15 = int_to_ptr.vmem [resolvable:$true] %s438_s15  ;;  %s463_s19 = int_to_ptr.vmem [resolvable:$true] %s462_s19 }
  0xef   : > { %s2316_s22 = scalar_lea.hbm %s3192_s8, 16 }
  0xf0   : > { %p2317_p13 = scmp.ne.s32.totalorder %s3192_s8, %s2316_s22  ;;  %p2323_p3 = scmp.lt.u32.totalorder %s2316_s22, %s3192_s8 }
  0xf2   : > { %p2319_p0 = pnand %p2317_p13, %p2677_p8 }
  0xf4   : > { %p2320_p1 = pneg %p2319_p0 }
  0xf6   : > { %p2325_p2 = pnand %p2323_p3, %p2320_p1 }
  0xf8   : > { %2328 = shalt.err (!%p2325_p2)
}
  0xf9   : > { %s2329_s14 = scalar_lea.vmem %s439_s15, 16  ;;  %s2336_s13 = scalar_lea.vmem %s439_s15, 32 }
  0xfa   : > { %p2330_p5 = scmp.ne.s32.totalorder %s439_s15, %s2329_s14  ;;  %p2337_p10 = scmp.lt.s32.totalorder %s439_s15, %s439_s15 }
  0xfb   : > { %p2338_p11 = scmp.lt.s32.totalorder %s2336_s13, %s2329_s14 }
  0xfc   : > { %p2332_p7 = pnand %p2330_p5, %p2677_p8 }
  0xfd   : > { %p2339_p12 = por %p2338_p11, %p2337_p10 }
  0xfe   : > { %p2333_p9 = pneg %p2332_p7 }
 0x100   : > { %p2340_p4 = pnand %p2339_p12, %p2333_p9 }
 0x102   : > { %2343 = shalt.err (!%p2340_p4)
}
 0x103   : > { %1921 = dma.hbm_to_vmem [thread:$0]  (!%p2663_p6), %s3192_s8, 16, %s439_s15, [#allocation15]  }
 0x104   : > { %s2344_s3 = scalar_lea.hbm %s3194_s10, 16 }
 0x105   : > { %p2345_p13 = scmp.ne.s32.totalorder %s3194_s10, %s2344_s3  ;;  %p2351_p3 = scmp.lt.u32.totalorder %s2344_s3, %s3194_s10 }
 0x107   : > { %p2347_p0 = pnand %p2345_p13, %p2677_p8 }
 0x109   : > { %p2348_p1 = pneg %p2347_p0 }
 0x10b   : > { %p2353_p2 = pnand %p2351_p3, %p2348_p1 }
 0x10d   : > { %2356 = shalt.err (!%p2353_p2)
}
 0x10e   : > { %s2357_s1 = scalar_lea.vmem %s463_s19, 16  ;;  %s2364_s15 = scalar_lea.vmem %s463_s19, 32 }
 0x10f   : > { %p2358_p5 = scmp.ne.s32.totalorder %s463_s19, %s2357_s1  ;;  %p2365_p10 = scmp.lt.s32.totalorder %s463_s19, %s463_s19 }
 0x110   : > { %p2366_p11 = scmp.lt.s32.totalorder %s2364_s15, %s2357_s1 }
 0x111   : > { %p2360_p7 = pnand %p2358_p5, %p2677_p8 }
 0x112   : > { %p2367_p12 = por %p2366_p11, %p2365_p10 }
 0x113   : > { %p2361_p9 = pneg %p2360_p7 }
 0x115   : > { %p2368_p4 = pnand %p2367_p12, %p2361_p9 }
 0x117   : > { %2371 = shalt.err (!%p2368_p4)
}
 0x118   : > { %1927 = dma.hbm_to_vmem [thread:$0]  (!%p2663_p6), %s3194_s10, 16, %s463_s19, [#allocation18]  }
 0x119   : > { %s2535_s13 = smov [#allocation22]   ;;  %s2372_s23 = scalar_lea.hbm %s3196_s12, 16 }
 0x11a   : > { %s486_s24 = sshll.u32 %s2535_s13, 4  ;;  %p2373_p13 = scmp.ne.s32.totalorder %s3196_s12, %s2372_s23  ;;  %s487_s24 = int_to_ptr.vmem [resolvable:$true] %s486_s24 }
 0x11b   : > { %p2379_p3 = scmp.lt.u32.totalorder %s2372_s23, %s3196_s12 }
 0x11c   : > { %p2375_p0 = pnand %p2373_p13, %p2677_p8 }
 0x11e   : > { %p2376_p1 = pneg %p2375_p0 }
 0x120   : > { %p2381_p2 = pnand %p2379_p3, %p2376_p1 }
 0x122   : > { %2384 = shalt.err (!%p2381_p2)
}
 0x123   : > { %s2385_s19 = scalar_lea.vmem %s487_s24, 16  ;;  %s2392_s17 = scalar_lea.vmem %s487_s24, 32 }
 0x124   : > { %p2386_p5 = scmp.ne.s32.totalorder %s487_s24, %s2385_s19  ;;  %p2393_p10 = scmp.lt.s32.totalorder %s487_s24, %s487_s24 }
 0x125   : > { %p2394_p11 = scmp.lt.s32.totalorder %s2392_s17, %s2385_s19 }
 0x126   : > { %p2388_p7 = pnand %p2386_p5, %p2677_p8 }
 0x127   : > { %p2395_p12 = por %p2394_p11, %p2393_p10 }
 0x128   : > { %p2389_p9 = pneg %p2388_p7 }
 0x12a   : > { %p2396_p4 = pnand %p2395_p12, %p2389_p9 }
 0x12c   : > { %2399 = shalt.err (!%p2396_p4)
}
 0x12d   : > { %s3220_s16 = sld [smem:[#allocation32_spill]]  ;;  %s1650_s20 = sadd.s32 4294967294, %s2520_s28  }
 0x12e   : > { %1933 = dma.hbm_to_vmem [thread:$0]  (!%p2663_p6), %s3196_s12, 16, %s487_s24, [#allocation21]  }
 0x12f   : > { %s2921_s18 = sadd.s32 1, %s2520_s28   ;;  %s42_s13 = sadd.s32 1, %s2516_s27 }
 0x130   : > { %s39_s14 = ssub.s32 %s2520_s28, %s2921_s18  ;;  %p49_p13 = scmp.ne.s32.totalorder %s2516_s27, %s2512_s26 }
 0x131   : > { %p40_p8 = scmp.eq.s32.totalorder %s39_s14, 0  ;;  %p50_p0 = scmp.eq.s32.totalorder %s2520_s28, 0 }
 0x132   : > { %p55_p1 = scmp.ne.s32.totalorder %s2512_s26, %s2508_s25  ;;  %p337_p7 = scmp.eq.s32.totalorder %s1650_s20, 1 }
 0x133   : > { %s2932_s29 = scalar_select %p40_p8, %s2516_s27, %s42_s13  }
 0x134   : > { %p2934_p3 = por %p50_p0, %p49_p13  ;;  %p3222_p2 = scmp.eq.s32.totalorder %s3220_s16, 0 }
 0x135   : > { %p331_p5 = scmp.eq.s32.totalorder %s3220_s16, 1  ;;  %p1954_p9 = scmp.lt.s32.totalorder %s2520_s28, 2 }
 0x136   : > { %p2940_p6 = por %p3222_p2, %p55_p1  ;;  %s497_s23 = sand.u32 1, %s2516_s27  }
 0x137   : > { %p2947_p10 = por %p331_p5, %p49_p13  ;;  %p2951_p11 = por %p337_p7, %p55_p1 }
 0x138   : > { %s1665_s22 = sshll.u32 %s497_s23, 3  ;;  %s1666_s30 = sshll.u32 %s2520_s28, 7 }
 0x139   : > { %s3224_s3 = scalar_select %p2947_p10, 1, 0 }
 0x13a   : > { %s3225_s21 = scalar_select %p2951_p11, 1, 0 }
 0x13b   : > { %s3226_s1 = sld [smem:[#allocation34_spill]]  ;;  %s501_s16 = scalar_lea.vmem [#allocation2], %s1665_s22 }
 0x13c   : > { %s508_s20 = sshll.u32 %s501_s16, 4  ;;  %p2965_p12 = pnand %p1954_p9, %p2934_p3  ;;  %s2961_s20 = int_to_ptr.vmem [resolvable:$true] %s508_s20 }
 0x13d   : > { %s498_s13 = scalar_lea.sflag [#allocation3], %s497_s23 }
 0x13e   : > { %p2402_p8 = pneg %p2965_p12 }
 0x141   : > { %s2959_s15 = scalar_lea.hbm %s3226_s1, %s1666_s30  ;;  %s2405_s19 = scalar_lea.hbm %s3226_s1, 256 }
 0x142   : > { %s2400_s2 = scalar_lea.hbm %s2959_s15, 128  ;;  %p2406_p1 = scmp.lt.u32.totalorder %s2959_s15, %s3226_s1 }
 0x143   : > { %p2401_p4 = scmp.ne.s32.totalorder %s2959_s15, %s2400_s2  ;;  %p2407_p3 = scmp.lt.u32.totalorder %s2405_s19, %s2400_s2 }
 0x144   : > { %p2409_p5 = scmp.lt.u32.totalorder %s2400_s2, %s2959_s15 }
 0x145   : > { %p2403_p13 = pnand %p2402_p8, %p2401_p4  ;;  %p2408_p2 = por %p2407_p3, %p2406_p1 }
 0x147   : > { %p2404_p0 = pneg %p2403_p13  ;;  %p2410_p7 = por %p2409_p5, %p2408_p2 }
 0x149   : > { %p2411_p9 = pnand %p2410_p7, %p2404_p0 }
 0x14b   : > { %2414 = shalt.err (!%p2411_p9)
}
 0x14c   : > { %s2415_s23 = scalar_lea.vmem %s2961_s20, 128  ;;  %s2536_s16 = smov [#allocation2]  }
 0x14d   : > { %p2416_p4 = scmp.ne.s32.totalorder %s2961_s20, %s2415_s23  ;;  %s2420_s22 = sshll.u32 %s2536_s16, 4  ;;  %s2421_s22 = int_to_ptr.vmem [resolvable:$false] %s2420_s22 }
 0x14e   : > { %s2422_s30 = scalar_lea.vmem %s2421_s22, 256  ;;  %p2423_p10 = scmp.lt.s32.totalorder %s2961_s20, %s2421_s22 }
 0x14f   : > { %p2418_p13 = pnand %p2416_p4, %p2402_p8  ;;  %p2424_p1 = scmp.lt.s32.totalorder %s2422_s30, %s2415_s23 }
 0x151   : > { %p2419_p11 = pneg %p2418_p13  ;;  %p2425_p3 = por %p2424_p1, %p2423_p10 }
 0x153   : > { %p2426_p2 = pnand %p2425_p3, %p2419_p11 }
 0x155   : > { %2429 = shalt.err (!%p2426_p2)
}
 0x156   : > { %1937 = dma.hbm_to_vmem [thread:$0]  (!%p2965_p12), %s2959_s15, 128, %s2961_s20, %s498_s13  }
 0x157   : > { %s3228_s2 = sld [smem:[#allocation33_spill]] }
 0x15d   : > { %p3229_p0 = scmp.ne.s32.totalorder %s3228_s2, 0 }
 0x15e   : > { %s2997_s19 = sand.u32 (!%p3229_p0), 1, %s2512_s26  }
 0x15f   : > { %517 = sbr.rel (%p3229_p0) target bundleno = 2937 (0xb79), region = 72  ;;  %s1668_s0 = sshll.u32 (!%p3229_p0), %s2997_s19, 3 }
 0x160   : > { %s520_s17 = scalar_lea.sflag (!%p3229_p0), [#allocation3], %s2997_s19  ;;  %s523_s23 = scalar_lea.vmem (!%p3229_p0), [#allocation2], %s1668_s0 }
 0x166   : > { %2475 = dma.done.wait (%p2940_p6), %s520_s17, 128  }
 0x167   : > { %2477 = vsyncadd (%p2940_p6), %s520_s17, 4294967168  ;;  %s3230_s15 = sld [smem:[#allocation32_spill]] }
 0x16d   : > { %p3231_p10 = scmp.eq.s32.totalorder %s3230_s15, 0 }
 0x16f   : > { %2479 = dma.done.wait (%p3231_p10), [#allocation6], 32   ;;  %p3232_p11 = pmov %p3231_p10 }
 0x170   : > { %p3233_p12 = pmov %p3231_p10 }
 0x171   : > { %2481 = vsyncadd (%p3232_p11), [#allocation6], 4294967264 }
 0x172   : > { %2483 = dma.done.wait (%p3233_p12), [#allocation9], 272   ;;  %p3234_p8 = pmov %p3231_p10 }
 0x174   : > { %2485 = vsyncadd (%p3234_p8), [#allocation9], 4294967024  ;;  %p3235_p5 = pmov %p3234_p8 }
 0x176   : > { %2487 = dma.done.wait (%p3235_p5), [#allocation12], 272   ;;  %p3236_p7 = pmov %p3235_p5 }
 0x177   : > { %p3237_p6 = pmov %p3235_p5 }
 0x178   : > { %2489 = vsyncadd (%p3236_p7), [#allocation12], 4294967024 }
 0x179   : > { %2491 = dma.done.wait (%p3237_p6), [#allocation15], 32   ;;  %p3238_p9 = pmov %p3235_p5 }
 0x17a   : > { %p3239_p4 = pmov %p3235_p5 }
 0x17b   : > { %2493 = vsyncadd (%p3238_p9), [#allocation15], 4294967264 }
 0x17c   : > { %2495 = dma.done.wait (%p3239_p4), [#allocation18], 272   ;;  %p3240_p13 = pmov %p3239_p4 }
 0x17d   : > { %p3241_p1 = pmov %p3239_p4 }
 0x17e   : > { %2497 = vsyncadd (%p3240_p13), [#allocation18], 4294967024 }
 0x17f   : > { %2499 = dma.done.wait (%p3241_p1), [#allocation21], 1040   ;;  %p3242_p3 = pmov %p3241_p1 }
 0x180   : > { %vm652_vm0 = vcmask 261120   ;;  %v3031_v0 = vld [vmem:[%s523_s23] sm:$0xff]  ;;  %v2030_v7 = vld [vmem:[#allocation8] sm:$0xff]   ;;  %v2537_v8 = vmov 0.0   ;;  %vm2538_vm1 = vmmov 0   ;;  %s2539_s24 = smov 120  }
 0x181   : > { %2501 = vsyncadd (%p3242_p3), [#allocation21], 4294966256  ;;  %v653_v1 = vsel %vm652_vm0, %v3031_v0, 0.0  ;;  %1753 = vmatprep.subr.bf16.mxu0 %v2537_v8  ;;  %1757 = vmatprep.mubr.msk.bf16.mxu0 %vm2538_vm1, %v2537_v8  ;;  %v2031_v9 = vld [vmem:[#allocation8 + $0x8] sm:$0xff]   ;;  %v1682_v14 = vld [vmem:[#allocation5] ss:$0 sm:$0xff] }
 0x182   : > { %654 = vadd.xlane.f32.xlu0 %v653_v1  ;;  %1754 = vmatpush3.bf16.msra.mxu0 %v2030_v7  ;;  %v1683_v16 = vld [vmem:[#allocation7] ss:$0 sm:$0xff]  ;;  %v1684_v20 = vld [vmem:[#allocation10] ss:$0 sm:$0xff]  ;;  %s2540_s20 = smov 96   ;;  %s2541_s14 = smov 88  }
 0x183   : > { %1773 = vmatprep.subr.bf16.mxu1 %v2537_v8  ;;  %1755 = vmatprep.subr.bf16.mxu0 %v2537_v8  ;;  %s2542_s13 = smov 80   ;;  %s2543_s16 = smov 112   ;;  %vm747_vm2 = vcmask 64512   ;;  %vm811_vm3 = vcmask 1043456   ;;  %vm1198_vm4 = vcmask 130048   ;;  %vm1200_vm5 = vcmask 195584  }
 0x184   : > { %1775 = vmatprep.mubr.msk.bf16.mxu1 %vm2538_vm1, %v2537_v8  ;;  %s2544_s22 = smov 72   ;;  %s2545_s30 = smov 104  }
 0x185   : > { %s2546_s2 = smov 64   ;;  %s2547_s17 = smov 56  }
 0x186   : > { %1756 = vmatpush3.bf16.msra.mxu0 %v2031_v9  ;;  %s2548_s23 = smov 48   ;;  %p3244_p0 = scmp.ne.s32.totalorder %s3224_s3, 0 }
 0x187   : > { %1761 = vmatprep.subr.bf16.mxu0 %v2537_v8 }
 0x20f   : > { %v655_v2 = vpop.xlane.xlu0 %654 }
 0x210   : > { %v657_v3 = vmul.f32 0.03125, %v655_v2 }
 0x212   : > { %v658_v4 = vsub.f32 %v3031_v0, %v657_v3 }
 0x214   : > { %v659_v5 = vmul.f32 %v658_v4, %v658_v4 }
 0x216   : > { %v660_v6 = vsel %vm652_vm0, %v659_v5, 0.0 }
 0x217   : > { %661 = vadd.xlane.f32.xlu0 %v660_v6 }
 0x2a4   : > { %v662_v10 = vpop.xlane.xlu0 %661 }
 0x2a5   : > { %v663_v11 = vmul.f32 0.03125, %v662_v10 }
 0x2a7   : > { %v664_v12 = vadd.f32 1e-05, %v663_v11 }
 0x2a9   : > { %2044 = vrsqrt.f32 %v664_v12 }
 0x2b3   : > { %v2045_v13 = vpop.eup %2044 }
 0x2b4   : > { %v666_v15 = vmul.f32 %v2045_v13, %v658_v4 }
 0x2b6   : > { %v673_v17 = vmul.f32 %v1682_v14, %v666_v15 }
 0x2b8   : > { %v680_v18 = vadd.f32 %v1683_v16, %v673_v17 }
 0x2ba   : > { %v681_v19 = vpack.c.bf16 %v680_v18, %v680_v18 }
 0x2bc   : > { %1758 = vmatmul.mubr.msk.bf16.vlgmr.msra.gmra.mrb[0].mxu0 %vm652_vm0, %v681_v19 }
 0x2bd   : > { %1763 = vmatprep.mubr.msk.bf16.mxu0 %vm2538_vm1, %v2537_v8 }
 0x38f   : > { %v737_v21 = vpop.f32.mrb[0].mxu0 }
 0x390   : > { %v738_v22 = vadd.f32 %v1684_v20, %v737_v21  ;;  %v1759_v23 = vpop.f32.mrb[1].mxu0 }
 0x391   : > { %v740_v24 = vpop.f32.mrb[2].mxu0 }
 0x392   : > { %v3048_v25 = vpack.c.bf16 %v738_v22, %v738_v22  ;;  %v1760_v26 = vpop.f32.mrb[3].mxu0 }
 0x394   : > { %855 = vrot.lane.b32.xlu0 %v3048_v25, %s2539_s24  ;;  %745 = vrot.lane.b32.xlu1 %v3048_v25, %s2540_s20  ;;  %s2549_s24 = smov 40   ;;  %s2550_s20 = smov 8  }
 0x398   : > { %857 = vrot.lane.b32.xlu1 %v3048_v25, %s2541_s14  ;;  %s2551_s14 = smov 16  }
 0x39c   : > { %967 = vrot.lane.b32.xlu1 %v3048_v25, %s2542_s13  ;;  %s2552_s13 = smov 24  }
 0x3a0   : > { %965 = vrot.lane.b32.xlu1 %v3048_v25, %s2543_s16  ;;  %s1716_s16 = sshll.u32 %s3230_s15, 7 }
 0x3a4   : > { %1077 = vrot.lane.b32.xlu1 %v3048_v25, %s2544_s22  ;;  %s613_s22 = scalar_lea.vmem [#allocation23], %s1668_s0  ;;  %s1453_s0 = scalar_lea.sflag [#allocation4], %s2997_s19 }
 0x3a8   : > { %1075 = vrot.lane.b32.xlu1 %v3048_v25, %s2545_s30  ;;  %s1466_s30 = sshll.u32 %s613_s22, 4  ;;  %s3141_s30 = int_to_ptr.vmem [resolvable:$true] %s1466_s30 }
 0x3a9   : > { %s2430_s15 = scalar_lea.vmem %s3141_s30, 128 }
 0x3aa   : > { %p2431_p2 = scmp.ne.s32.totalorder %s3141_s30, %s2430_s15 }
 0x3ac   : > { %p2432_p10 = pnand %p2431_p2, %p3244_p0 }
 0x3ae   : > { %p2433_p11 = pneg %p2432_p10 }
 0x406   : > { %v746_v27 = vpop.permute.xlu1 %745  ;;  %v856_v32 = vpop.permute.xlu0 %855 }
 0x407   : > { %v752_v28 = vsel %vm747_vm2, %v746_v27, 0 }
 0x408   : > { %1762 = vmatpush3.bf16.xpose.msra.mxu0 %v752_v28 }
 0x409   : > { %1767 = vmatprep.subr.bf16.mxu0 %v2537_v8 }
 0x40a   : > { %v858_v29 = vpop.permute.xlu1 %857 }
 0x40b   : > { %v863_v30 = vsel %vm747_vm2, %v858_v29, 0 }
 0x40c   : > { %1774 = vmatpush3.bf16.xpose.msra.mxu1 %v863_v30 }
 0x40d   : > { %1785 = vmatprep.subr.bf16.mxu1 %v2537_v8 }
 0x40e   : > { %v968_v31 = vpop.permute.xlu1 %967 }
 0x40f   : > { %1764 = vmatmul.mubr.msk.bf16.vlgmr.msra.gmra.mrb[4].mxu0 %vm747_vm2, %v3048_v25  ;;  %v973_v34 = vsel %vm747_vm2, %v968_v31, 0 }
 0x410   : > { %1769 = vmatprep.mubr.msk.bf16.mxu0 %vm2538_vm1, %v2537_v8 }
 0x412   : > { %v966_v33 = vpop.permute.xlu1 %965 }
 0x413   : > { %1776 = vmatmul.mubr.msk.bf16.vlgmr.msra.gmra.mrb[0].mxu1 %vm747_vm2, %v856_v32 }
 0x414   : > { %1786 = vmatpush3.bf16.xpose.msra.mxu1 %v973_v34  ;;  %1787 = vmatprep.mubr.msk.bf16.mxu1 %vm2538_vm1, %v2537_v8 }
 0x415   : > { %1797 = vmatprep.subr.bf16.mxu1 %v2537_v8 }
 0x416   : > { %v1078_v35 = vpop.permute.xlu1 %1077 }
 0x417   : > { %v1083_v36 = vsel %vm747_vm2, %v1078_v35, 0 }
 0x41a   : > { %v1076_v37 = vpop.permute.xlu1 %1075 }
 0x41b   : > { %1788 = vmatmul.mubr.msk.bf16.vlgmr.msra.gmra.mrb[4].mxu1 %vm747_vm2, %v966_v33 }
 0x41c   : > { %1798 = vmatpush3.bf16.xpose.msra.mxu1 %v1083_v36  ;;  %1799 = vmatprep.mubr.msk.bf16.mxu1 %vm2538_vm1, %v2537_v8 }
 0x41d   : > { %1809 = vmatprep.subr.bf16.mxu1 %v2537_v8 }
 0x423   : > { %1800 = vmatmul.mubr.msk.bf16.vlgmr.msra.gmra.mrb[8].mxu1 %vm747_vm2, %v1076_v37 }
 0x424   : > { %1813 = vmatprep.mubr.msk.bf16.mxu1 %vm2538_vm1, %v2537_v8 }
 0x4e2   : > { %v788_v38 = vpop.f32.mrb[4].mxu0 }
 0x4e3   : > { %v1765_v39 = vpop.f32.mrb[5].mxu0  ;;  %v794_v40 = vsel %vm747_vm2, %v788_v38, -inf }
 0x4e4   : > { %795 = vmax.xlane.f32.xlu1 %v794_v40  ;;  %v791_v41 = vpop.f32.mrb[6].mxu0 }
 0x4e5   : > { %v1766_v42 = vpop.f32.mrb[7].mxu0 }
 0x4e6   : > { %v899_v43 = vpop.f32.mrb[0].mxu1 }
 0x4e7   : > { %v1777_v44 = vpop.f32.mrb[1].mxu1  ;;  %v905_v45 = vsel %vm747_vm2, %v899_v43, -inf }
 0x4e8   : > { %906 = vmax.xlane.f32.xlu0 %v905_v45  ;;  %v902_v46 = vpop.f32.mrb[2].mxu1 }
 0x4e9   : > { %v1778_v47 = vpop.f32.mrb[3].mxu1 }
 0x4ee   : > { %v1009_v48 = vpop.f32.mrb[4].mxu1 }
 0x4ef   : > { %v1789_v49 = vpop.f32.mrb[5].mxu1  ;;  %v1015_v50 = vsel %vm747_vm2, %v1009_v48, -inf }
 0x4f0   : > { %v1012_v51 = vpop.f32.mrb[6].mxu1  ;;  %1016 = vmax.xlane.f32.xlu1 %v1015_v50  ;;  %v2033_v49 = vld [vmem:[#allocation11 + $0x8] sm:$0xff]  }
 0x4f1   : > { %v1790_v52 = vpop.f32.mrb[7].mxu1 }
 0x4f6   : > { %v1119_v53 = vpop.f32.mrb[8].mxu1 }
 0x4f7   : > { %v1801_v54 = vpop.f32.mrb[9].mxu1  ;;  %v1125_v55 = vsel %vm747_vm2, %v1119_v53, -inf }
 0x4f8   : > { %1126 = vmax.xlane.f32.xlu0 %v1125_v55  ;;  %v1122_v56 = vpop.f32.mrb[10].mxu1 }
 0x4f9   : > { %v1802_v57 = vpop.f32.mrb[11].mxu1 }
 0x571   : > { %v796_v58 = vpop.xlane.xlu1 %795 }
 0x572   : > { %v797_v59 = vsub.f32 %v788_v38, %v796_v58 }
 0x574   : > { %v798_v60 = vmul.f32 1.442695, %v797_v59 }
 0x575   : > { %v907_v61 = vpop.xlane.xlu0 %906 }
 0x576   : > { %2046 = vpow2.f32 %v798_v60  ;;  %v908_v62 = vsub.f32 %v899_v43, %v907_v61 }
 0x578   : > { %v909_v63 = vmul.f32 1.442695, %v908_v62 }
 0x57a   : > { %2048 = vpow2.f32 %v909_v63 }
 0x57d   : > { %v1017_v11 = vpop.xlane.xlu1 %1016 }
 0x57e   : > { %v1018_v12 = vsub.f32 %v1009_v48, %v1017_v11  ;;  %v2032_v48 = vld [vmem:[#allocation11] sm:$0xff]  }
 0x57f   : > { %1810 = vmatpush3.bf16.msra.mxu1 %v2032_v48 }
 0x580   : > { %v2047_v1 = vpop.eup %2046  ;;  %v1019_v13 = vmul.f32 1.442695, %v1018_v12  ;;  %1811 = vmatprep.subr.bf16.mxu1 %v2537_v8 }
 0x581   : > { %v800_v2 = vsel %vm747_vm2, %v2047_v1, 0.0 }
 0x582   : > { %801 = vadd.xlane.f32.xlu1 %v800_v2  ;;  %v1696_v2 = vld [vmem:[#allocation13] ss:$0 sm:$0xff] }
 0x583   : > { %1812 = vmatpush3.bf16.msra.mxu1 %v2033_v49 }
 0x584   : > { %v2049_v3 = vpop.eup %2048  ;;  %1825 = vmatprep.subr.bf16.mxu1 %v2537_v8 }
 0x585   : > { %v1127_v4 = vpop.xlane.xlu0 %1126  ;;  %v911_v5 = vsel %vm747_vm2, %v2049_v3, 0.0 }
 0x586   : > { %v1128_v6 = vsub.f32 %v1119_v53, %v1127_v4  ;;  %912 = vadd.xlane.f32.xlu0 %v911_v5 }
 0x588   : > { %v1129_v7 = vmul.f32 1.442695, %v1128_v6 }
 0x58a   : > { %2050 = vpow2.f32 %v1129_v7 }
 0x58b   : > { %2052 = vpow2.f32 %v1019_v13 }
 0x593   : > { %806 = vrot.lane.b32.xlu1 %v3048_v25, %s2546_s2 }
 0x594   : > { %v2051_v9 = vpop.eup %2050 }
 0x595   : > { %v1131_v10 = vsel %vm747_vm2, %v2051_v9, 0.0  ;;  %v2053_v14 = vpop.eup %2052 }
 0x596   : > { %1132 = vadd.xlane.f32.xlu0 %v1131_v10  ;;  %v1021_v15 = vsel %vm747_vm2, %v2053_v14, 0.0 }
 0x5ac   : > { %917 = vrot.lane.b32.xlu0 %v3048_v25, %s2547_s17 }
 0x5b7   : > { %1022 = vadd.xlane.f32.xlu1 %v1021_v15 }
 0x5c8   : > { %1027 = vrot.lane.b32.xlu1 %v3048_v25, %s2548_s23  ;;  %s3243_s23 = sld [smem:[#allocation38_spill]] }
 0x5cc   : > { %1137 = vrot.lane.b32.xlu1 %v3048_v25, %s2549_s24 }
 0x5ce   : > { %s3139_s24 = scalar_lea.hbm %s3243_s23, %s1716_s16 }
 0x60f   : > { %v802_v16 = vpop.xlane.xlu1 %801 }
 0x610   : > { %2054 = vrcp.f32 %v802_v16  ;;  %v2034_v16 = vld [vmem:[#allocation17] sm:$0xff]  }
 0x613   : > { %v807_v17 = vpop.permute.xlu1 %806  ;;  %v913_v19 = vpop.xlane.xlu0 %912 }
 0x614   : > { %v813_v18 = vsel %vm811_vm3, %v807_v17, 0  ;;  %2056 = vrcp.f32 %v913_v19  ;;  %v2035_v17 = vld [vmem:[#allocation17 + $0x8] sm:$0xff]  }
 0x615   : > { %1768 = vmatpush3.bf16.msra.mxu0 %v813_v18  ;;  %v2037_v18 = vld [vmem:[#allocation20 + $0x8] sm:$0xff]   ;;  %v2038_v19 = vld [vmem:[#allocation20 + $0x10] sm:$0xff]  }
 0x616   : > { %1779 = vmatprep.subr.bf16.mxu0 %v2537_v8 }
 0x61a   : > { %v2055_v20 = vpop.eup %2054 }
 0x61b   : > { %v804_v21 = vmul.f32 %v2055_v20, %v2047_v1  ;;  %v2039_v20 = vld [vmem:[#allocation20 + $0x18] sm:$0xff]  }
 0x61d   : > { %v805_v22 = vpack.c.bf16 %v804_v21, %v804_v21  ;;  %v2040_v21 = vld [vmem:[#allocation20 + $0x20] sm:$0xff]  }
 0x61e   : > { %v2057_v23 = vpop.eup %2056 }
 0x61f   : > { %1770 = vmatmul.mubr.msk.bf16.vlgmr.msra.gmra.mrb[8].mxu0 %vm747_vm2, %v805_v22  ;;  %v915_v25 = vmul.f32 %v2057_v23, %v2049_v3  ;;  %v2041_v22 = vld [vmem:[#allocation20 + $0x28] sm:$0xff]  }
 0x620   : > { %1781 = vmatprep.mubr.msk.bf16.mxu0 %vm2538_vm1, %v2537_v8 }
 0x621   : > { %v916_v28 = vpack.c.bf16 %v915_v25, %v915_v25 }
 0x623   : > { %v1133_v24 = vpop.xlane.xlu0 %1132 }
 0x627   : > { %v918_v26 = vpop.permute.xlu0 %917 }
 0x628   : > { %v923_v27 = vsel %vm811_vm3, %v918_v26, 0 }
 0x629   : > { %1780 = vmatpush3.bf16.msra.mxu0 %v923_v27  ;;  %v1700_v27 = vld [vmem:[#allocation14] ss:$0 sm:$0xff] }
 0x62a   : > { %1791 = vmatprep.subr.bf16.mxu0 %v2537_v8 }
 0x62c   : > { %1782 = vmatmul.mubr.msk.bf16.vlgmr.msra.gmra.mrb[12].mxu0 %vm747_vm2, %v916_v28 }
 0x62d   : > { %1793 = vmatprep.mubr.msk.bf16.mxu0 %vm2538_vm1, %v2537_v8 }
 0x644   : > { %v1023_v29 = vpop.xlane.xlu1 %1022 }
 0x645   : > { %2058 = vrcp.f32 %v1023_v29  ;;  %v1701_v29 = vld [vmem:[#allocation16] ss:$0 sm:$0xff] }
 0x646   : > { %2060 = vrcp.f32 %v1133_v24 }
 0x648   : > { %v1028_v30 = vpop.permute.xlu1 %1027 }
 0x649   : > { %v1033_v31 = vsel %vm811_vm3, %v1028_v30, 0 }
 0x64a   : > { %1792 = vmatpush3.bf16.msra.mxu0 %v1033_v31 }
 0x64b   : > { %1803 = vmatprep.subr.bf16.mxu0 %v2537_v8 }
 0x64c   : > { %v1138_v34 = vpop.permute.xlu1 %1137 }
 0x64d   : > { %v1143_v37 = vsel %vm811_vm3, %v1138_v34, 0  ;;  %v2043_v34 = vld [vmem:[#allocation20 + $0x38] sm:$0xff]  }
 0x64f   : > { %v2059_v32 = vpop.eup %2058 }
 0x650   : > { %v1025_v33 = vmul.f32 %v2059_v32, %v2053_v14  ;;  %v2061_v36 = vpop.eup %2060 }
 0x651   : > { %v1135_v38 = vmul.f32 %v2061_v36, %v2051_v9 }
 0x652   : > { %v1026_v35 = vpack.c.bf16 %v1025_v33, %v1025_v33  ;;  %v2042_v33 = vld [vmem:[#allocation20 + $0x30] sm:$0xff]  }
 0x653   : > { %v1136_v39 = vpack.c.bf16 %v1135_v38, %v1135_v38 }
 0x654   : > { %1794 = vmatmul.mubr.msk.bf16.vlgmr.msra.gmra.mrb[16].mxu0 %vm747_vm2, %v1026_v35  ;;  %v1702_v35 = vld [vmem:[#allocation19] ss:$0 sm:$0xff] }
 0x655   : > { %1804 = vmatpush3.bf16.msra.mxu0 %v1143_v37  ;;  %1805 = vmatprep.mubr.msk.bf16.mxu0 %vm2538_vm1, %v2537_v8 }
 0x656   : > { %1817 = vmatprep.subr.bf16.mxu0 %v2537_v8 }
 0x65c   : > { %1806 = vmatmul.mubr.msk.bf16.vlgmr.msra.gmra.mrb[20].mxu0 %vm747_vm2, %v1136_v39 }
 0x65d   : > { %1821 = vmatprep.mubr.msk.bf16.mxu0 %vm2538_vm1, %v2537_v8  ;;  %1818 = vmatpush3.bf16.msra.mxu0 %v2034_v16 }
 0x65e   : > { %1819 = vmatprep.subr.bf16.mxu0 %v2537_v8 }
 0x661   : > { %1820 = vmatpush3.bf16.msra.mxu0 %v2035_v17 }
 0x6f2   : > { %v849_v40 = vpop.f32.mrb[8].mxu0 }
 0x6f3   : > { %v1771_v41 = vpop.f32.mrb[9].mxu0 }
 0x6f4   : > { %v852_v42 = vpop.f32.mrb[10].mxu0 }
 0x6f5   : > { %v1772_v43 = vpop.f32.mrb[11].mxu0 }
 0x6f6   : > { %v1706_v43 = vld [vmem:[#allocation22] ss:$0 sm:$0xff] }
 0x6ff   : > { %v959_v44 = vpop.f32.mrb[12].mxu0 }
 0x700   : > { %1186 = vrot.lane.b32.xlu0 %v959_v44, %s2550_s20  ;;  %v1783_v45 = vpop.f32.mrb[13].mxu0  ;;  %s2553_s20 = smov [#allocation23]  }
 0x701   : > { %v962_v46 = vpop.f32.mrb[14].mxu0 }
 0x702   : > { %v1784_v47 = vpop.f32.mrb[15].mxu0 }
 0x727   : > { %v1069_v50 = vpop.f32.mrb[16].mxu0 }
 0x728   : > { %1190 = vrot.lane.b32.xlu1 %v1069_v50, %s2551_s14  ;;  %v1795_v51 = vpop.f32.mrb[17].mxu0  ;;  %s2434_s14 = sshll.u32 %s2553_s20, 4  ;;  %s2435_s14 = int_to_ptr.vmem [resolvable:$false] %s2434_s14 }
 0x729   : > { %v1072_v52 = vpop.f32.mrb[18].mxu0  ;;  %p2437_p12 = scmp.lt.s32.totalorder %s3141_s30, %s2435_s14 }
 0x72a   : > { %v1796_v53 = vpop.f32.mrb[19].mxu0 }
 0x72f   : > { %v1179_v54 = vpop.f32.mrb[20].mxu0 }
 0x730   : > { %1194 = vrot.lane.b32.xlu0 %v1179_v54, %s2552_s13  ;;  %v1807_v55 = vpop.f32.mrb[21].mxu0  ;;  %s2436_s13 = scalar_lea.vmem %s2435_s14, 256 }
 0x731   : > { %v1182_v56 = vpop.f32.mrb[22].mxu0  ;;  %p2438_p8 = scmp.lt.s32.totalorder %s2436_s13, %s2430_s15 }
 0x732   : > { %v1808_v57 = vpop.f32.mrb[23].mxu0 }
 0x733   : > { %p2439_p5 = por %p2438_p8, %p2437_p12 }
 0x735   : > { %p2440_p7 = pnand %p2439_p5, %p2433_p11 }
 0x772   : > { %v1187_v58 = vpop.permute.xlu0 %1186 }
 0x773   : > { %v1197_v60 = vsel %vm747_vm2, %v849_v40, %v1187_v58 }
 0x79a   : > { %v1191_v59 = vpop.permute.xlu1 %1190 }
 0x79b   : > { %v1199_v61 = vsel %vm1198_vm4, %v1197_v60, %v1191_v59 }
 0x7a2   : > { %v1195_v62 = vpop.permute.xlu0 %1194 }
 0x7a3   : > { %v1201_v63 = vsel %vm1200_vm5, %v1199_v61, %v1195_v62 }
 0x7a4   : > { %v1202_v1 = vpack.c.bf16 %v1201_v63, %v1201_v63 }
 0x7a6   : > { %1814 = vmatmul.mubr.msk.bf16.vlgmr.msra.gmra.mrb[12].mxu1 %vm652_vm0, %v1202_v1 }
 0x7a7   : > { %1841 = vmatprep.mubr.msk.bf16.mxu1 %vm2538_vm1, %v2537_v8 }
 0x879   : > { %v1258_v3 = vpop.f32.mrb[12].mxu1 }
 0x87a   : > { %v1259_v4 = vadd.f32 %v1696_v2, %v1258_v3  ;;  %v1815_v5 = vpop.f32.mrb[13].mxu1 }
 0x87b   : > { %v1261_v6 = vpop.f32.mrb[14].mxu1 }
 0x87c   : > { %v3117_v7 = vadd.f32 %v1259_v4, %v3031_v0  ;;  %v1816_v9 = vpop.f32.mrb[15].mxu1  ;;  %v2036_v0 = vld [vmem:[#allocation20] sm:$0xff]  }
 0x87d   : > { %1826 = vmatpush3.bf16.msra.mxu1 %v2036_v0 }
 0x87e   : > { %v1265_v10 = vsel %vm652_vm0, %v3117_v7, 0.0  ;;  %1827 = vmatprep.subr.bf16.mxu1 %v2537_v8 }
 0x87f   : > { %1266 = vadd.xlane.f32.xlu1 %v1265_v10 }
 0x881   : > { %1828 = vmatpush3.bf16.msra.mxu1 %v2037_v18 }
 0x882   : > { %1829 = vmatprep.subr.bf16.mxu1 %v2537_v8 }
 0x885   : > { %1830 = vmatpush3.bf16.msra.mxu1 %v2038_v19 }
 0x886   : > { %1831 = vmatprep.subr.bf16.mxu1 %v2537_v8 }
 0x889   : > { %1832 = vmatpush3.bf16.msra.mxu1 %v2039_v20 }
 0x88a   : > { %1833 = vmatprep.subr.bf16.mxu1 %v2537_v8 }
 0x88d   : > { %1834 = vmatpush3.bf16.msra.mxu1 %v2040_v21 }
 0x88e   : > { %1835 = vmatprep.subr.bf16.mxu1 %v2537_v8 }
 0x891   : > { %1836 = vmatpush3.bf16.msra.mxu1 %v2041_v22 }
 0x892   : > { %1837 = vmatprep.subr.bf16.mxu1 %v2537_v8 }
 0x895   : > { %1838 = vmatpush3.bf16.msra.mxu1 %v2042_v33 }
 0x896   : > { %1839 = vmatprep.subr.bf16.mxu1 %v2537_v8 }
 0x899   : > { %1840 = vmatpush3.bf16.msra.mxu1 %v2043_v34 }
 0x90c   : > { %v1267_v11 = vpop.xlane.xlu1 %1266 }
 0x90d   : > { %v1268_v12 = vmul.f32 0.03125, %v1267_v11 }
 0x90f   : > { %v1269_v13 = vsub.f32 %v3117_v7, %v1268_v12 }
 0x911   : > { %v1270_v14 = vmul.f32 %v1269_v13, %v1269_v13 }
 0x913   : > { %v1271_v15 = vsel %vm652_vm0, %v1270_v14, 0.0 }
 0x914   : > { %1272 = vadd.xlane.f32.xlu0 %v1271_v15 }
 0x9a1   : > { %v1273_v23 = vpop.xlane.xlu0 %1272 }
 0x9a2   : > { %v1274_v24 = vmul.f32 0.03125, %v1273_v23 }
 0x9a4   : > { %v1275_v25 = vadd.f32 1e-05, %v1274_v24 }
 0x9a6   : > { %2062 = vrsqrt.f32 %v1275_v25 }
 0x9b0   : > { %v2063_v26 = vpop.eup %2062 }
 0x9b1   : > { %v1277_v28 = vmul.f32 %v2063_v26, %v1269_v13 }
 0x9b3   : > { %v1284_v30 = vmul.f32 %v1700_v27, %v1277_v28 }
 0x9b5   : > { %v1291_v31 = vadd.f32 %v1701_v29, %v1284_v30 }
 0x9b7   : > { %v1292_v32 = vpack.c.bf16 %v1291_v31, %v1291_v31 }
 0x9b9   : > { %1822 = vmatmul.mubr.msk.bf16.vlgmr.msra.gmra.mrb[24].mxu0 %vm652_vm0, %v1292_v32 }
 0xa8c   : > { %v1348_v36 = vpop.f32.mrb[24].mxu0 }
 0xa8d   : > { %v1349_v37 = vadd.f32 %v1702_v35, %v1348_v36  ;;  %v1823_v38 = vpop.f32.mrb[25].mxu0 }
 0xa8e   : > { %v1351_v39 = vpop.f32.mrb[26].mxu0 }
 0xa8f   : > { %v1354_v40 = vmax.f32 %v1349_v37, 0.0  ;;  %v1824_v41 = vpop.f32.mrb[27].mxu0 }
 0xa91   : > { %v1355_v42 = vpack.c.bf16 %v1354_v40, %v1354_v40 }
 0xa93   : > { %1842 = vmatmul.mubr.bf16.vlgmr.msra.gmra.mrb[16].mxu1 %v1355_v42 }
 0xb66   : > { %v1444_v44 = vpop.f32.mrb[16].mxu1 }
 0xb67   : > { %v1445_v8 = vadd.f32 %v1706_v43, %v1444_v44  ;;  %v1843_v45 = vpop.f32.mrb[17].mxu1 }
 0xb68   : > { %v1447_v46 = vpop.f32.mrb[18].mxu1 }
 0xb69   : > { %v1450_v47 = vadd.f32 %v1445_v8, %v3117_v7  ;;  %v1844_v48 = vpop.f32.mrb[19].mxu1 }
 0xb6b   : > { %1451 = vst.msk [vmem:[%s613_s22] sm:$0xff] %vm652_vm0, %v1450_v47 }
 0xb6c   : > { %2443 = shalt.err (!%p2440_p7)
}
 0xb6d   : > { %s2444_s19 = scalar_lea.hbm %s3139_s24, 128  ;;  %s2448_s2 = scalar_lea.hbm %s3243_s23, 256 }
 0xb6e   : > { %p2445_p6 = scmp.ne.s32.totalorder %s3139_s24, %s2444_s19  ;;  %p2449_p13 = scmp.lt.u32.totalorder %s3139_s24, %s3243_s23 }
 0xb6f   : > { %p2450_p1 = scmp.lt.u32.totalorder %s2448_s2, %s2444_s19  ;;  %p2452_p2 = scmp.lt.u32.totalorder %s2444_s19, %s3139_s24 }
 0xb70   : > { %p2446_p9 = pnand %p2445_p6, %p3244_p0 }
 0xb71   : > { %p2451_p3 = por %p2450_p1, %p2449_p13 }
 0xb72   : > { %p2447_p4 = pneg %p2446_p9 }
 0xb73   : > { %p2453_p10 = por %p2452_p2, %p2451_p3 }
 0xb75   : > { %p2454_p11 = pnand %p2453_p10, %p2447_p4 }
 0xb77   : > { %2457 = shalt.err (!%p2454_p11)
}
 0xb78   : > { %1895 = dma.vmem_to_hbm [thread:$0]  (%p3244_p0), %s3141_s30, 128, %s3139_s24, %s1453_s0  }
 0xb79 PF: > { %s1478_s15 = sand.u32 1, %s2508_s25   ;;  %p3245_p12 = scmp.ne.s32.totalorder %s3225_s21, 0 }
 0xb7a   : > { %p3246_p8 = scmp.ge.s32.totalorder %s2520_s28, 2  ;;  %s1479_s14 = scalar_lea.sflag [#allocation4], %s1478_s15 }
 0xb7c   : > { %p1939_p5 = pnand %p3246_p8, %p3245_p12 }
 0xb7e   : > { %2503 = dma.done.wait (!%p1939_p5), %s1479_s14, 128  }
 0xb7f   : > { %2505 = vsyncadd (!%p1939_p5), %s1479_s14, 4294967168  ;;  %p32_p7 = scmp.ge.s32.totalorder %s2921_s18, 4   ;;  %s3247_s25 = smov %s2512_s26 }
 0xb80   : > { %s3248_s26 = smov %s2516_s27  ;;  %s3249_s27 = smov %s2932_s29 }
 0xb81   : > { %s3250_s28 = smov %s2921_s18  ;;  %34 = sbr.rel (!%p32_p7) target bundleno = 17 (0x11), region = 165 }
 0xb88   :  { %1484 = vsyncpa [#allocation3], 1 }
 0xb89   :  { %1486 = vsyncpa [#allocation3 + $0x1], 1 }
 0xb8a   :  { %1487 = vsyncpa [#allocation6], 1 }
 0xb8b   :  { %1488 = vsyncpa [#allocation9], 1 }
 0xb8c   :  { %1489 = vsyncpa [#allocation12], 1 }
 0xb8d   :  { %1490 = vsyncpa [#allocation15], 1 }
 0xb8e   :  { %1491 = vsyncpa [#allocation18], 1 }
 0xb8f   :  { %1492 = vsyncpa [#allocation21], 1 }
 0xb90   :  { %1493 = vsyncpa [#allocation4], 1 }
 0xb91   :  { %1495 = vsyncpa [#allocation4 + $0x1], 1 }

</bundles_post_ra>
